<compile_context>
chip_gen: v5e
topology: v5e:2x2
jax: 0.10.0
libtpu: 0.0.40
codegen_flags: <defaults>
</compile_context>

<pallas_src>
import functools

import numpy as np
import jax
import jax.numpy as jnp
from jax.experimental import pallas as pl
from jax.experimental.pallas import tpu as pltpu


def _round_up(x, m):
    return (x + m - 1) // m * m


def _msa1_kernel(x_ref, halo_ref, wf_ref, bf_ref, wo_ref, bo_ref, hmr_ref, hmb_ref,
                 o_ref, *, tile_l, d_pad, seq_len):
    T, Dp, L = tile_l, d_pad, seq_len
    j = pl.program_id(1)                        # L-tile index

    x_t = x_ref[0]                              # (nhid, T) channels-major tile

    # ---- fused Q|K|V projection: one resident-weight MXU pass per tile ------
    qkv = jnp.dot(wf_ref[...], x_t, preferred_element_type=jnp.float32) + bf_ref[...]
    q = qkv[0:Dp]                               # (Dp, T); rows >= D are exactly 0
    k = qkv[Dp:2 * Dp]
    v = qkv[2 * Dp:3 * Dp]

    # ---- zero K/V at out-of-range positions ---------------------------------
    # (F.unfold zero-pads AFTER the projection, so the pad value is exactly 0,
    #  not the bias.  Also kills the L-padding columns of the last tile.)
    pos = jax.lax.broadcasted_iota(jnp.int32, (1, T), 1)
    in_range = (pos + j * T < L).astype(jnp.float32)
    k = k * in_range
    v = v * in_range

    # ---- halo K/V columns (projected + edge-masked in the wrapper) ----------
    halo = halo_ref[0, 0]                       # (2*Dp, 2) f32
    k_left = halo[0:Dp, 0:1]
    v_left = halo[Dp:2 * Dp, 0:1]
    k_right = halo[0:Dp, 1:2]
    v_right = halo[Dp:2 * Dp, 1:2]

    is_first = pos == 0
    is_last = pos == (T - 1)

    # ---- per-head scores: +-1 shift via XLU roll + patched edge column; -----
    # the three head-sum reductions are fused into ONE (nhead,Dp)@(Dp,3T) MXU
    # launch.  hmr has 1/sqrt(head_dim) folded in, so no extra scaling mul.
    k_prev = jnp.where(is_first, k_left, pltpu.roll(k, 1, 1))
    k_next = jnp.where(is_last, k_right, pltpu.roll(k, T - 1, 1))
    qk_cat = jnp.concatenate([q * k_prev, q * k, q * k_next], axis=1)      # (Dp, 3T)
    s = jnp.dot(hmr_ref[...], qk_cat, preferred_element_type=jnp.float32)  # (nhead, 3T)
    s_prev, s_mid, s_next = s[:, 0:T], s[:, T:2 * T], s[:, 2 * T:3 * T]

    # ---- softmax over the 3-wide window (numerically stable, exact recip) ---
    m = jnp.maximum(jnp.maximum(s_prev, s_mid), s_next)
    e_prev = jnp.exp(s_prev - m)
    e_mid = jnp.exp(s_mid - m)
    e_next = jnp.exp(s_next - m)
    inv_den = pl.reciprocal(e_prev + e_mid + e_next, approx=False)
    a_cat = jnp.concatenate([e_prev * inv_den, e_mid * inv_den, e_next * inv_den],
                            axis=1)                                        # (nhead, 3T)

    # ---- broadcast head weights back to (Dp, 3T) with one MXU launch --------
    w_cat = jnp.dot(hmb_ref[...], a_cat, preferred_element_type=jnp.float32)

    # materialize shifted V only right before the weighted sum (fewer live temps)
    v_prev = jnp.where(is_first, v_left, pltpu.roll(v, 1, 1))
    v_next = jnp.where(is_last, v_right, pltpu.roll(v, T - 1, 1))
    att = w_cat[:, 0:T] * v_prev + w_cat[:, T:2 * T] * v + w_cat[:, 2 * T:3 * T] * v_next

    # ---- output projection (channels-major -> lane-dense store) -------------
    ret = jnp.dot(wo_ref[...], att.astype(wo_ref.dtype),
                  preferred_element_type=jnp.float32) + bo_ref[...]
    o_ref[0] = ret.astype(o_ref.dtype)


def _prep_params(params, *, nhead, head_dim, matmul_dtype):
    """Fuse/pad the 1x1-conv weights for the channels-major kernel."""
    wq_w, wq_b, wk_w, wk_b, wv_w, wv_b, wo_w, wo_b = params   # torch layout: (out,in),(out,)
    D = nhead * head_dim
    Dp = _round_up(D, 8)                       # 8-sublane aligned sections (f32)

    def pad_w(w):                              # (D, nhid) -> (Dp, nhid), zero rows
        return jnp.pad(w, ((0, Dp - D), (0, 0)))

    def pad_b(bias):                           # (D,) -> (Dp, 1) column
        return jnp.pad(bias, (0, Dp - D))[:, None]

    wf = jnp.concatenate([pad_w(wq_w), pad_w(wk_w), pad_w(wv_w)], axis=0)   # (3Dp, nhid)
    bf = jnp.concatenate([pad_b(wq_b), pad_b(wk_b), pad_b(wv_b)], axis=0)   # (3Dp, 1)
    wo = jnp.pad(wo_w, ((0, 0), (0, Dp - D)))                                # (nhid, Dp)
    bo = wo_b[:, None]                                                       # (nhid, 1)

    hm = np.zeros((nhead, Dp), np.float32)     # 0/1 head membership mask
    for h in range(nhead):
        hm[h, h * head_dim:(h + 1) * head_dim] = 1.0
    hmr = jnp.asarray(hm / np.sqrt(head_dim))  # reduce mask, 1/sqrt(hd) folded in
    hmb = jnp.asarray(hm.T)                    # broadcast-back mask

    return (wf.astype(matmul_dtype), bf.astype(jnp.float32),
            wo.astype(matmul_dtype), bo.astype(jnp.float32), hmr, hmb, Dp)


def msa1_forward(x_nchw, params, *, nhead, head_dim, tile_l=512,
                 matmul_dtype=jnp.bfloat16):
    """x_nchw: (B, nhid, L, 1) float32, as the PyTorch module expects.

    tile_l: max L-tile size (multiple of 128).  512 amortizes per-step overhead
            and the resident-weight MXU push; it is capped to the padded L and
            auto-split when B==1 so the grid keeps >= 2 points (v7x megacore).
    matmul_dtype: jnp.bfloat16 (default; full-rate MXU on v6e/v7x, half the x
            DMA) or jnp.float32 (use on v5e, which has no bf16 VPU, or when
            bit-closeness to the f32 reference matters).  Attention math and
            accumulation are always f32.
    """
    B, nhid, L, W = x_nchw.shape
    assert W == 1, "module semantics require trailing spatial dim == 1"
    assert tile_l % 128 == 0, "tile_l must be a multiple of 128 (lane width)"

    # ---- tile-size selection ------------------------------------------------
    T = min(tile_l, _round_up(L, 128))
    if B == 1 and T >= L and L > 128:
        # keep >= 2 grid points so both v7x TensorCores get work
        T = max(128, _round_up((L + 1) // 2, 128))
    NT = -(-L // T)
    Lp = NT * T

    wq_w, wq_b, wk_w, wk_b, wv_w, wv_b, wo_w, wo_b = params
    D = nhead * head_dim
    wf, bf, wo, bo, hmr, hmb, Dp = _prep_params(
        params, nhead=nhead, head_dim=head_dim, matmul_dtype=matmul_dtype)

    # ---- channels-major input (native NCHW minus the trailing 1) ------------
    x_sq = x_nchw[..., 0]                                        # (B, nhid, L)
    x_in = x_sq if Lp == L else jnp.pad(x_sq, ((0, 0), (0, 0), (0, Lp - L)))
    if x_in.dtype != matmul_dtype:
        x_in = x_in.astype(matmul_dtype)

    # ---- halo K/V columns, projected ONCE in the wrapper ---------------------
    # Tile j needs K/V at positions j*T-1 (left) and (j+1)*T (right); halos
    # outside [0, L) are exactly 0 (F.unfold zero-pads AFTER the projection).
    if NT > 1:
        bnd_pos = np.stack([np.arange(1, NT) * T - 1,
                            np.arange(1, NT) * T], axis=-1).reshape(-1)     # 2*(NT-1)
        x_bnd = x_sq[:, :, bnd_pos]                                          # (B, nhid, 2*(NT-1))
        k_bnd = jnp.einsum("oc,bcl->bol", wk_w, x_bnd) + wk_b[None, :, None]
        v_bnd = jnp.einsum("oc,bcl->bol", wv_w, x_bnd) + wv_b[None, :, None]
        kv_bnd = jnp.concatenate(
            [jnp.pad(k_bnd, ((0, 0), (0, Dp - D), (0, 0))),
             jnp.pad(v_bnd, ((0, 0), (0, Dp - D), (0, 0)))], axis=1)         # (B, 2Dp, 2*(NT-1))
        kv_bnd = kv_bnd.reshape(B, 2 * Dp, NT - 1, 2)
        zcol = jnp.zeros((B, 2 * Dp, 1), jnp.float32)
        left = jnp.concatenate([zcol, kv_bnd[:, :, :, 0]], axis=2)           # (B, 2Dp, NT)
        right = jnp.concatenate([kv_bnd[:, :, :, 1], zcol], axis=2)          # (B, 2Dp, NT)
        kv_halo = jnp.transpose(jnp.stack([left, right], axis=-1),
                                (0, 2, 1, 3)).astype(jnp.float32)            # (B, NT, 2Dp, 2)
    else:
        kv_halo = jnp.zeros((B, 1, 2 * Dp, 2), jnp.float32)

    # ---- VMEM budget & cost estimate derived from the actual tile sizes ------
    isz = jnp.dtype(matmul_dtype).itemsize
    block_bytes = 2 * nhid * T * (isz + 4)                  # double-buffered x & out tiles
    block_bytes += 2 * (2 * Dp * 2 * 4)                     # halo block
    block_bytes += 2 * (4 * Dp * nhid * isz                 # wf + wo (double-buffered)
                        + (3 * Dp + nhid) * 4               # biases
                        + 2 * nhead * Dp * 4)               # head masks
    temp_bytes = 26 * Dp * T * 4                            # upper bound on live f32 temps
    vmem_limit = int(min(64 << 20, max(32 << 20, block_bytes + temp_bytes + (4 << 20))))

    flops_tile = 2 * T * (3 * Dp * nhid + 3 * nhead * Dp + 3 * Dp * nhead + nhid * Dp) \
        + 20 * Dp * T
    cost = pl.CostEstimate(
        flops=int(B * NT * flops_tile),
        transcendentals=int(B * NT * 3 * nhead * T),
        bytes_accessed=int(B * NT * (nhid * T * isz + nhid * T * 4 + 2 * Dp * 2 * 4)),
    )

    kernel = functools.partial(_msa1_kernel, tile_l=T, d_pad=Dp, seq_len=L)
    out = pl.pallas_call(
        kernel,
        out_shape=jax.ShapeDtypeStruct((B, nhid, Lp), jnp.float32),
        grid_spec=pltpu.PrefetchScalarGridSpec(
            num_scalar_prefetch=0,
            grid=(B, NT),
            in_specs=[
                pl.BlockSpec((1, nhid, T), lambda b, j: (b, 0, j)),          # x tile
                pl.BlockSpec((1, 1, 2 * Dp, 2), lambda b, j: (b, j, 0, 0)),  # halo K|V cols
                pl.BlockSpec((3 * Dp, nhid), lambda b, j: (0, 0)),           # fused Wqkv
                pl.BlockSpec((3 * Dp, 1), lambda b, j: (0, 0)),              # fused bias
                pl.BlockSpec((nhid, Dp), lambda b, j: (0, 0)),               # Wo
                pl.BlockSpec((nhid, 1), lambda b, j: (0, 0)),                # bo
                pl.BlockSpec((nhead, Dp), lambda b, j: (0, 0)),              # head reduce mask
                pl.BlockSpec((Dp, nhead), lambda b, j: (0, 0)),              # head bcast mask
            ],
            out_specs=pl.BlockSpec((1, nhid, T), lambda b, j: (b, 0, j)),    # lane-dense
        ),
        compiler_params=pltpu.CompilerParams(
            # both grid axes independent -> shardable across TCs (v7x megacore)
            dimension_semantics=("parallel", "parallel"),
            vmem_limit_bytes=vmem_limit,
        ),
        cost_estimate=cost,
    )(x_in, kv_halo, wf, bf, wo, bo, hmr, hmb)

    if Lp != L:
        out = out[:, :, :L]
    return out[..., None]                                        # (B, nhid, L, 1)


def _reference_forward(x_nchw, params, *, nhead, head_dim):
    """Pure-JAX re-implementation of the PyTorch forward (ax=None, no dropout)."""
    wq_w, wq_b, wk_w, wk_b, wv_w, wv_b, wo_w, wo_b = params
    B, nhid, L, _ = x_nchw.shape
    x = jnp.transpose(x_nchw[..., 0], (0, 2, 1))                 # (B, L, nhid)
    q = x @ wq_w.T + wq_b
    k = x @ wk_w.T + wk_b
    v = x @ wv_w.T + wv_b
    D = nhead * head_dim
    q = q.reshape(B, L, nhead, head_dim)
    k = k.reshape(B, L, nhead, head_dim)
    v = v.reshape(B, L, nhead, head_dim)

    def shift(a, off):
        pad = jnp.zeros_like(a[:, :1])
        if off == -1:
            return jnp.concatenate([pad, a[:, :-1]], axis=1)
        if off == 1:
            return jnp.concatenate([a[:, 1:], pad], axis=1)
        return a

    ks = jnp.stack([shift(k, -1), k, shift(k, 1)], axis=2)       # (B, L, 3, nhead, hd)
    vs = jnp.stack([shift(v, -1), v, shift(v, 1)], axis=2)
    s = jnp.einsum("blhd,bluhd->bluh", q, ks) / np.sqrt(head_dim)
    a = jax.nn.softmax(s, axis=2)
    att = jnp.einsum("bluh,bluhd->blhd", a, vs).reshape(B, L, D)
    ret = att @ wo_w.T + wo_b
    return jnp.transpose(ret, (0, 2, 1))[..., None]


def _run_case(name, *, B, nhid, nhead, head_dim, L, tile_l, matmul_dtype, rtol, atol):
    D = nhead * head_dim
    key = jax.random.PRNGKey(0)
    ks = jax.random.split(key, 9)
    s_in = 1.0 / np.sqrt(nhid)
    s_d = 1.0 / np.sqrt(D)
    # torch Conv2d(1x1) layout: weight (out, in), bias (out,)
    wq_w = jax.random.normal(ks[0], (D, nhid), jnp.float32) * s_in
    wq_b = jax.random.normal(ks[1], (D,), jnp.float32) * 0.1
    wk_w = jax.random.normal(ks[2], (D, nhid), jnp.float32) * s_in
    wk_b = jax.random.normal(ks[3], (D,), jnp.float32) * 0.1
    wv_w = jax.random.normal(ks[4], (D, nhid), jnp.float32) * s_in
    wv_b = jax.random.normal(ks[5], (D,), jnp.float32) * 0.1
    wo_w = jax.random.normal(ks[6], (nhid, D), jnp.float32) * s_d
    wo_b = jax.random.normal(ks[7], (nhid,), jnp.float32) * 0.1
    params = (wq_w, wq_b, wk_w, wk_b, wv_w, wv_b, wo_w, wo_b)
    x = jax.random.normal(ks[8], (B, nhid, L, 1), jnp.float32)

    out = msa1_forward(x, params, nhead=nhead, head_dim=head_dim,
                       tile_l=tile_l, matmul_dtype=matmul_dtype)
    out = jax.block_until_ready(out)
    ref = _reference_forward(x, params, nhead=nhead, head_dim=head_dim)
    np.testing.assert_allclose(np.asarray(out), np.asarray(ref), rtol=rtol, atol=atol)


if __name__ == "__main__":
    # multi-tile along L (NT=2, ragged tail) -> wrapper-projected halo + edge masks
    _run_case("f32_two_tiles", B=2, nhid=32, nhead=4, head_dim=16, L=200,
              tile_l=128, matmul_dtype=jnp.float32, rtol=5e-4, atol=5e-4)
    # module defaults nhead=6, head_dim=50 (D=300 -> Dp=304), default big tile
    _run_case("f32_default_heads", B=2, nhid=48, nhead=6, head_dim=50, L=131,
              tile_l=512, matmul_dtype=jnp.float32, rtol=5e-4, atol=5e-4)
    # B==1: tile auto-split so the grid keeps 2 points (v7x megacore path)
    _run_case("f32_b1_split", B=1, nhid=32, nhead=4, head_dim=16, L=300,
              tile_l=512, matmul_dtype=jnp.float32, rtol=5e-4, atol=5e-4)
    # bf16 projection path (default on v6e/v7x): half the DMA, full-rate MXU
    _run_case("bf16_two_tiles", B=2, nhid=32, nhead=4, head_dim=16, L=200,
              tile_l=128, matmul_dtype=jnp.bfloat16, rtol=6e-2, atol=6e-2)
    print("KERNEL_OK")
</pallas_src>

<mosaic_0001>
module attributes {stable_mosaic.version = 11 : i64} {
  func.func @_msa1_kernel(%arg0: i32, %arg1: i32, %arg2: memref<1x32x128xf32, #tpu.memory_space<vmem>>, %arg3: memref<1x1x128x2xf32, #tpu.memory_space<vmem>>, %arg4: memref<192x32xf32, #tpu.memory_space<vmem>>, %arg5: memref<192x1xf32, #tpu.memory_space<vmem>>, %arg6: memref<32x64xf32, #tpu.memory_space<vmem>>, %arg7: memref<32x1xf32, #tpu.memory_space<vmem>>, %arg8: memref<4x64xf32, #tpu.memory_space<vmem>>, %arg9: memref<64x4xf32, #tpu.memory_space<vmem>>, %arg10: memref<1x32x128xf32, #tpu.memory_space<vmem>>) attributes {dimension_semantics = [#tpu.dimension_semantics<parallel>, #tpu.dimension_semantics<parallel>], iteration_bounds = array<i64: 2, 2>, scalar_prefetch = 0 : i64, scratch_operands = 0 : i64, tpu.core_type = #tpu.core_type<tc>, window_params = [{transform_indices = @transform_0, window_bounds = array<i64: 1, 32, 128>}, {transform_indices = @transform_1, window_bounds = array<i64: 1, 1, 128, 2>}, {pipeline_mode = #tpu.pipeline_mode<synchronous>, transform_indices = @transform_2, window_bounds = array<i64: 192, 32>}, {pipeline_mode = #tpu.pipeline_mode<synchronous>, transform_indices = @transform_3, window_bounds = array<i64: 192, 1>}, {pipeline_mode = #tpu.pipeline_mode<synchronous>, transform_indices = @transform_4, window_bounds = array<i64: 32, 64>}, {pipeline_mode = #tpu.pipeline_mode<synchronous>, transform_indices = @transform_5, window_bounds = array<i64: 32, 1>}, {pipeline_mode = #tpu.pipeline_mode<synchronous>, transform_indices = @transform_6, window_bounds = array<i64: 4, 64>}, {pipeline_mode = #tpu.pipeline_mode<synchronous>, transform_indices = @transform_7, window_bounds = array<i64: 64, 4>}, {transform_indices = @transform_8, window_bounds = array<i64: 1, 32, 128>}]} {
    %c0 = arith.constant 0 : index
    %c0_0 = arith.constant 0 : index
    %c0_1 = arith.constant 0 : index
    %0 = vector.load %arg2[%c0, %c0_0, %c0_1] : memref<1x32x128xf32, #tpu.memory_space<vmem>>, vector<1x32x128xf32>
    %1 = vector.shape_cast %0 : vector<1x32x128xf32> to vector<32x128xf32>
    %c0_2 = arith.constant 0 : index
    %c0_3 = arith.constant 0 : index
    %2 = vector.load %arg4[%c0_2, %c0_3] : memref<192x32xf32, #tpu.memory_space<vmem>>, vector<192x32xf32>
    %cst = arith.constant dense<0.000000e+00> : vector<192x128xf32>
    %3 = tpu.matmul %2, %1, %cst {dimension_numbers = #tpu.dot_dimension_numbers<[1], [0], [0], [1], [0, 0, 1, 1], [], []>} : vector<192x32xf32>, vector<32x128xf32>, vector<192x128xf32> -> vector<192x128xf32>
    %c0_4 = arith.constant 0 : index
    %c0_5 = arith.constant 0 : index
    %4 = vector.load %arg5[%c0_4, %c0_5] : memref<192x1xf32, #tpu.memory_space<vmem>>, vector<192x1xf32>
    %5 = vector.broadcast %4 : vector<192x1xf32> to vector<192x128xf32>
    %6 = arith.addf %3, %5 : vector<192x128xf32>
    %7 = vector.extract_strided_slice %6 {offsets = [0, 0], sizes = [64, 128], strides = [1, 1]} : vector<192x128xf32> to vector<64x128xf32>
    %8 = vector.extract_strided_slice %6 {offsets = [64, 0], sizes = [64, 128], strides = [1, 1]} : vector<192x128xf32> to vector<64x128xf32>
    %9 = vector.extract_strided_slice %6 {offsets = [128, 0], sizes = [64, 128], strides = [1, 1]} : vector<192x128xf32> to vector<64x128xf32>
    %10 = tpu.iota {dimensions = array<i32: 1>} : vector<1x128xi32>
    %c128_i32 = arith.constant 128 : i32
    %11 = arith.muli %arg1, %c128_i32 : i32
    %12 = vector.broadcast %11 : i32 to vector<1x128xi32>
    %13 = arith.addi %10, %12 : vector<1x128xi32>
    %c200_i32 = arith.constant 200 : i32
    %14 = vector.broadcast %c200_i32 : i32 to vector<1x128xi32>
    %15 = arith.cmpi slt, %13, %14 : vector<1x128xi32>
    %16 = arith.extui %15 : vector<1x128xi1> to vector<1x128xi32>
    %17 = arith.sitofp %16 : vector<1x128xi32> to vector<1x128xf32>
    %18 = vector.broadcast %17 : vector<1x128xf32> to vector<64x128xf32>
    %19 = arith.mulf %8, %18 : vector<64x128xf32>
    %20 = vector.broadcast %17 : vector<1x128xf32> to vector<64x128xf32>
    %21 = arith.mulf %9, %20 : vector<64x128xf32>
    %c0_6 = arith.constant 0 : index
    %c0_7 = arith.constant 0 : index
    %c0_8 = arith.constant 0 : index
    %c0_9 = arith.constant 0 : index
    %22 = vector.load %arg3[%c0_6, %c0_7, %c0_8, %c0_9] : memref<1x1x128x2xf32, #tpu.memory_space<vmem>>, vector<1x1x128x2xf32>
    %23 = vector.shape_cast %22 : vector<1x1x128x2xf32> to vector<128x2xf32>
    %24 = vector.extract_strided_slice %23 {offsets = [0, 0], sizes = [64, 1], strides = [1, 1]} : vector<128x2xf32> to vector<64x1xf32>
    %25 = vector.extract_strided_slice %23 {offsets = [64, 0], sizes = [64, 1], strides = [1, 1]} : vector<128x2xf32> to vector<64x1xf32>
    %26 = vector.extract_strided_slice %23 {offsets = [0, 1], sizes = [64, 1], strides = [1, 1]} : vector<128x2xf32> to vector<64x1xf32>
    %27 = vector.extract_strided_slice %23 {offsets = [64, 1], sizes = [64, 1], strides = [1, 1]} : vector<128x2xf32> to vector<64x1xf32>
    %c0_i32 = arith.constant 0 : i32
    %28 = vector.broadcast %c0_i32 : i32 to vector<1x128xi32>
    %29 = arith.cmpi eq, %10, %28 : vector<1x128xi32>
    %c127_i32 = arith.constant 127 : i32
    %30 = vector.broadcast %c127_i32 : i32 to vector<1x128xi32>
    %31 = arith.cmpi eq, %10, %30 : vector<1x128xi32>
    %c1_i32 = arith.constant 1 : i32
    %32 = tpu.dynamic_rotate %19 by %c1_i32 dim 1 : vector<64x128xf32>, i32 -> vector<64x128xf32>
    %33 = vector.shape_cast %29 : vector<1x128xi1> to vector<1x128xi1>
    %34 = vector.broadcast %33 : vector<1x128xi1> to vector<64x128xi1>
    %35 = vector.shape_cast %24 : vector<64x1xf32> to vector<64x1xf32>
    %36 = vector.broadcast %35 : vector<64x1xf32> to vector<64x128xf32>
    %37 = arith.select %34, %36, %32 : vector<64x128xi1>, vector<64x128xf32>
    %c127_i32_10 = arith.constant 127 : i32
    %38 = tpu.dynamic_rotate %19 by %c127_i32_10 dim 1 : vector<64x128xf32>, i32 -> vector<64x128xf32>
    %39 = vector.shape_cast %31 : vector<1x128xi1> to vector<1x128xi1>
    %40 = vector.broadcast %39 : vector<1x128xi1> to vector<64x128xi1>
    %41 = vector.shape_cast %26 : vector<64x1xf32> to vector<64x1xf32>
    %42 = vector.broadcast %41 : vector<64x1xf32> to vector<64x128xf32>
    %43 = arith.select %40, %42, %38 : vector<64x128xi1>, vector<64x128xf32>
    %44 = arith.mulf %7, %37 : vector<64x128xf32>
    %45 = arith.mulf %7, %19 : vector<64x128xf32>
    %46 = arith.mulf %7, %43 : vector<64x128xf32>
    %47 = tpu.concatenate %44, %45, %46 in 1 : vector<64x128xf32>, vector<64x128xf32>, vector<64x128xf32> -> vector<64x384xf32>
    %c0_11 = arith.constant 0 : index
    %c0_12 = arith.constant 0 : index
    %48 = vector.load %arg8[%c0_11, %c0_12] : memref<4x64xf32, #tpu.memory_space<vmem>>, vector<4x64xf32>
    %cst_13 = arith.constant dense<0.000000e+00> : vector<4x384xf32>
    %49 = tpu.matmul %48, %47, %cst_13 {dimension_numbers = #tpu.dot_dimension_numbers<[1], [0], [0], [1], [0, 0, 1, 1], [], []>} : vector<4x64xf32>, vector<64x384xf32>, vector<4x384xf32> -> vector<4x384xf32>
    %50 = vector.extract_strided_slice %49 {offsets = [0, 0], sizes = [4, 128], strides = [1, 1]} : vector<4x384xf32> to vector<4x128xf32>
    %51 = vector.extract_strided_slice %49 {offsets = [0, 128], sizes = [4, 128], strides = [1, 1]} : vector<4x384xf32> to vector<4x128xf32>
    %52 = vector.extract_strided_slice %49 {offsets = [0, 256], sizes = [4, 128], strides = [1, 1]} : vector<4x384xf32> to vector<4x128xf32>
    %53 = arith.maximumf %50, %51 : vector<4x128xf32>
    %54 = arith.maximumf %53, %52 : vector<4x128xf32>
    %55 = arith.subf %50, %54 : vector<4x128xf32>
    %56 = math.exp %55 : vector<4x128xf32>
    %57 = arith.subf %51, %54 : vector<4x128xf32>
    %58 = math.exp %57 : vector<4x128xf32>
    %59 = arith.subf %52, %54 : vector<4x128xf32>
    %60 = math.exp %59 : vector<4x128xf32>
    %61 = arith.addf %56, %58 : vector<4x128xf32>
    %62 = arith.addf %61, %60 : vector<4x128xf32>
    %63 = tpu.reciprocal %62 : vector<4x128xf32> -> vector<4x128xf32>
    %64 = arith.mulf %56, %63 : vector<4x128xf32>
    %65 = arith.mulf %58, %63 : vector<4x128xf32>
    %66 = arith.mulf %60, %63 : vector<4x128xf32>
    %67 = tpu.concatenate %64, %65, %66 in 1 : vector<4x128xf32>, vector<4x128xf32>, vector<4x128xf32> -> vector<4x384xf32>
    %c0_14 = arith.constant 0 : index
    %c0_15 = arith.constant 0 : index
    %68 = vector.load %arg9[%c0_14, %c0_15] : memref<64x4xf32, #tpu.memory_space<vmem>>, vector<64x4xf32>
    %cst_16 = arith.constant dense<0.000000e+00> : vector<64x384xf32>
    %69 = tpu.matmul %68, %67, %cst_16 {dimension_numbers = #tpu.dot_dimension_numbers<[1], [0], [0], [1], [0, 0, 1, 1], [], []>} : vector<64x4xf32>, vector<4x384xf32>, vector<64x384xf32> -> vector<64x384xf32>
    %c1_i32_17 = arith.constant 1 : i32
    %70 = tpu.dynamic_rotate %21 by %c1_i32_17 dim 1 : vector<64x128xf32>, i32 -> vector<64x128xf32>
    %71 = vector.shape_cast %29 : vector<1x128xi1> to vector<1x128xi1>
    %72 = vector.broadcast %71 : vector<1x128xi1> to vector<64x128xi1>
    %73 = vector.shape_cast %25 : vector<64x1xf32> to vector<64x1xf32>
    %74 = vector.broadcast %73 : vector<64x1xf32> to vector<64x128xf32>
    %75 = arith.select %72, %74, %70 : vector<64x128xi1>, vector<64x128xf32>
    %c127_i32_18 = arith.constant 127 : i32
    %76 = tpu.dynamic_rotate %21 by %c127_i32_18 dim 1 : vector<64x128xf32>, i32 -> vector<64x128xf32>
    %77 = vector.shape_cast %31 : vector<1x128xi1> to vector<1x128xi1>
    %78 = vector.broadcast %77 : vector<1x128xi1> to vector<64x128xi1>
    %79 = vector.shape_cast %27 : vector<64x1xf32> to vector<64x1xf32>
    %80 = vector.broadcast %79 : vector<64x1xf32> to vector<64x128xf32>
    %81 = arith.select %78, %80, %76 : vector<64x128xi1>, vector<64x128xf32>
    %82 = vector.extract_strided_slice %69 {offsets = [0, 0], sizes = [64, 128], strides = [1, 1]} : vector<64x384xf32> to vector<64x128xf32>
    %83 = arith.mulf %82, %75 : vector<64x128xf32>
    %84 = vector.extract_strided_slice %69 {offsets = [0, 128], sizes = [64, 128], strides = [1, 1]} : vector<64x384xf32> to vector<64x128xf32>
    %85 = arith.mulf %84, %21 : vector<64x128xf32>
    %86 = arith.addf %83, %85 : vector<64x128xf32>
    %87 = vector.extract_strided_slice %69 {offsets = [0, 256], sizes = [64, 128], strides = [1, 1]} : vector<64x384xf32> to vector<64x128xf32>
    %88 = arith.mulf %87, %81 : vector<64x128xf32>
    %89 = arith.addf %86, %88 : vector<64x128xf32>
    %c0_19 = arith.constant 0 : index
    %c0_20 = arith.constant 0 : index
    %90 = vector.load %arg6[%c0_19, %c0_20] : memref<32x64xf32, #tpu.memory_space<vmem>>, vector<32x64xf32>
    %cst_21 = arith.constant dense<0.000000e+00> : vector<32x128xf32>
    %91 = tpu.matmul %90, %89, %cst_21 {dimension_numbers = #tpu.dot_dimension_numbers<[1], [0], [0], [1], [0, 0, 1, 1], [], []>} : vector<32x64xf32>, vector<64x128xf32>, vector<32x128xf32> -> vector<32x128xf32>
    %c0_22 = arith.constant 0 : index
    %c0_23 = arith.constant 0 : index
    %92 = vector.load %arg7[%c0_22, %c0_23] : memref<32x1xf32, #tpu.memory_space<vmem>>, vector<32x1xf32>
    %93 = vector.broadcast %92 : vector<32x1xf32> to vector<32x128xf32>
    %94 = arith.addf %91, %93 : vector<32x128xf32>
    %c0_24 = arith.constant 0 : index
    %c0_25 = arith.constant 0 : index
    %c0_26 = arith.constant 0 : index
    %95 = vector.load %arg10[%c0_24, %c0_25, %c0_26] : memref<1x32x128xf32, #tpu.memory_space<vmem>>, vector<1x32x128xf32>
    %96 = vector.shape_cast %95 : vector<1x32x128xf32> to vector<32x128xf32>
    %97 = vector.shape_cast %94 : vector<32x128xf32> to vector<1x32x128xf32>
    tpu.vector_store %arg10[%c0_24, %c0_25, %c0_26], %97 {strides = array<i32>} : memref<1x32x128xf32, #tpu.memory_space<vmem>>, vector<1x32x128xf32>,
    return
  }
  func.func @transform_0(%arg0: i32, %arg1: i32) -> (i32, i32, i32) {
    %c0_i32 = arith.constant 0 : i32
    %c0_i32_0 = arith.constant 0 : i32
    return %arg0, %c0_i32, %arg1 : i32, i32, i32
  }
  func.func @transform_1(%arg0: i32, %arg1: i32) -> (i32, i32, i32, i32) {
    %c0_i32 = arith.constant 0 : i32
    %c0_i32_0 = arith.constant 0 : i32
    %c0_i32_1 = arith.constant 0 : i32
    return %arg0, %arg1, %c0_i32, %c0_i32_0 : i32, i32, i32, i32
  }
  func.func @transform_2(%arg0: i32, %arg1: i32) -> (i32, i32) {
    %c0_i32 = arith.constant 0 : i32
    %c0_i32_0 = arith.constant 0 : i32
    %c0_i32_1 = arith.constant 0 : i32
    return %c0_i32, %c0_i32_0 : i32, i32
  }
  func.func @transform_3(%arg0: i32, %arg1: i32) -> (i32, i32) {
    %c0_i32 = arith.constant 0 : i32
    %c0_i32_0 = arith.constant 0 : i32
    %c0_i32_1 = arith.constant 0 : i32
    return %c0_i32, %c0_i32_0 : i32, i32
  }
  func.func @transform_4(%arg0: i32, %arg1: i32) -> (i32, i32) {
    %c0_i32 = arith.constant 0 : i32
    %c0_i32_0 = arith.constant 0 : i32
    %c0_i32_1 = arith.constant 0 : i32
    return %c0_i32, %c0_i32_0 : i32, i32
  }
  func.func @transform_5(%arg0: i32, %arg1: i32) -> (i32, i32) {
    %c0_i32 = arith.constant 0 : i32
    %c0_i32_0 = arith.constant 0 : i32
    %c0_i32_1 = arith.constant 0 : i32
    return %c0_i32, %c0_i32_0 : i32, i32
  }
  func.func @transform_6(%arg0: i32, %arg1: i32) -> (i32, i32) {
    %c0_i32 = arith.constant 0 : i32
    %c0_i32_0 = arith.constant 0 : i32
    %c0_i32_1 = arith.constant 0 : i32
    return %c0_i32, %c0_i32_0 : i32, i32
  }
  func.func @transform_7(%arg0: i32, %arg1: i32) -> (i32, i32) {
    %c0_i32 = arith.constant 0 : i32
    %c0_i32_0 = arith.constant 0 : i32
    %c0_i32_1 = arith.constant 0 : i32
    return %c0_i32, %c0_i32_0 : i32, i32
  }
  func.func @transform_8(%arg0: i32, %arg1: i32) -> (i32, i32, i32) {
    %c0_i32 = arith.constant 0 : i32
    %c0_i32_0 = arith.constant 0 : i32
    return %arg0, %c0_i32, %arg1 : i32, i32, i32
  }
}

</mosaic_0001>

<bundles_post_ra>
// kernel: tpu_custom_call.1
= control target key start
LH: loop header
LB: loop body
LE: loop exit
PB: predicated region body
PF: predicated region fallthrough
CT: control target
= control target key end

     0   :  { %s2678_s0 = inlined_call_operand.vmem [shape: f32[2,32,256], index: 0, kind: input, shape index: {}]   ;;  %s2679_s1 = inlined_call_operand.vmem [shape: f32[2,2,128,2], index: 1, kind: input, shape index: {}]   ;;  %s2680_s2 = inlined_call_operand.vmem [shape: f32[192,32], index: 2, kind: input, shape index: {}]   ;;  %s2681_s3 = inlined_call_operand.vmem [shape: f32[192,1], index: 3, kind: input, shape index: {}]   ;;  %s2682_s4 = inlined_call_operand.vmem [shape: f32[32,64], index: 4, kind: input, shape index: {}]   ;;  %s2683_s5 = inlined_call_operand.vmem [shape: f32[32,1], index: 5, kind: input, shape index: {}]   ;;  %s2684_s6 = inlined_call_operand.vmem [shape: f32[4,64], index: 6, kind: input, shape index: {}]   ;;  %s2685_s7 = inlined_call_operand.vmem [shape: f32[64,4], index: 7, kind: input, shape index: {}]   ;;  %s2686_s8 = inlined_call_operand.hbm [shape: f32[2,32,256], index: 8, kind: output, shape index: {}]  }
   0x1   :  { %2692 = sst [smem:[#allocation10_spill]] %s2678_s0 }
   0x2   :  { %13 = vsyncpa [#allocation4], 0 }
   0x3   :  { %15 = vsyncpa [#allocation4 + $0x1], 0  ;;  %s1885_s27 = smov 0   ;;  %s1887_s28 = smov 0  }
   0x4   :  { %s1889_s29 = smov 0   ;;  %s1891_s30 = smov 0  }
   0x5   :  { %s1893_s9 = smov 0   ;;  %s1895_s10 = smov 0  }
   0x6   :  { %s1897_s11 = smov 0   ;;  %s1899_s12 = smov 0  }
   0x7 LB: > { %2693 = sst [smem:[#allocation6_spill]] %s1822_s10  ;;  %s1542_s13 = sadd.s32 4294967295, %s1830_s12   ;;  %s1830_s12 = sphi %s1899_s12, %s21_s12   ;;  %s1826_s11 = sphi %s1897_s11, %s2705_s11   ;;  %s1822_s10 = sphi %s1895_s10, %s2704_s10   ;;  %s1818_s9 = sphi %s1893_s9, %s2703_s9   ;;  %s1814_s30 = sphi %s1891_s30, %s2702_s30   ;;  %s1810_s29 = sphi %s1889_s29, %s2708_s29   ;;  %s1806_s28 = sphi %s1887_s28, %s2707_s28   ;;  %s1802_s27 = sphi %s1885_s27, %s2706_s27  }
   0x8   : > { %2694 = sst [smem:[#allocation7_spill]] %s1826_s11  ;;  %s1543_s14 = sadd.s32 4294967294, %s1830_s12  }
   0x9   : > { %s30_s15 = sadd.s32 1, %s1822_s10  ;;  %s33_s16 = sadd.s32 1, %s1826_s11 }
   0xa   : > { %p31_p0 = scmp.ge.s32.totalorder %s30_s15, 2  ;;  %p49_p1 = scmp.ne.s32.totalorder %s1810_s29, %s1806_s28 }
   0xb   : > { %p50_p2 = scmp.eq.s32.totalorder %s1830_s12, 0  ;;  %p235_p5 = scmp.eq.s32.totalorder %s1542_s13, 3 }
   0xc   : > { %s2710_s15 = smov (%p31_p0, %s30_s15), 0  ;;  %s2712_s16 = smov (!%p31_p0, %s33_s16), %s1826_s11 }
   0xd   : > { %2695 = sst [smem:[#allocation8_spill]] %s2710_s15  ;;  %s38_s17 = ssub.s32 %s1822_s10, %s2710_s15 }
   0xe   : > { %p1937_p3 = por %p50_p2, %p49_p1  ;;  %p35_p4 = scmp.ge.s32.totalorder %s2712_s16, 2 }
   0xf   : > { %p240_p6 = scmp.ne.s32.totalorder %s1806_s28, %s1802_s27  ;;  %p241_p7 = scmp.eq.s32.totalorder %s1543_s14, 3 }
  0x10   : > { %s2714_s16 = smov (%p35_p4, %s2712_s16), 0  ;;  %p1945_p8 = por %p235_p5, %p49_p1 }
  0x11   : > { %2697 = sst [smem:[#allocation9_spill]] %s2714_s16  ;;  %p1949_p9 = por %p241_p7, %p240_p6 }
  0x12   : > { %s37_s21 = ssub.s32 %s1826_s11, %s2714_s16  ;;  %s42_s23 = sadd.s32 1, %s1810_s29 }
  0x13   : > { %s39_s22 = sor.u32 %s38_s17, %s37_s21  ;;  %p1545_p11 = scmp.ge.s32.totalorder %s1830_s12, 4 }
  0x14   : > { %p40_p10 = scmp.eq.s32.totalorder %s39_s22, 0 }
  0x15   : > { %275 = sbr.rel (%p1545_p11) target bundleno = 40 (0x28), region = 40 }
  0x16   : > { %s1957_s24 = scalar_select %p40_p10, %s1810_s29, %s42_s23  }
  0x1a   : > { %278 = sbr.rel (!%p1937_p3) target bundleno = 40 (0x28), region = 44  ;;  %s280_s25 = sand.u32 (%p1937_p3), 1, %s1810_s29  }
  0x1b   : > { %s1547_s26 = sshll.u32 (%p1937_p3), %s1826_s11, 3  ;;  %s1546_s13 = sshll.u32 (%p1937_p3), %s280_s25, 5 }
  0x1c   : > { %s284_s14 = sadd.s32 (%p1937_p3), %s1822_s10, %s1547_s26  ;;  %s2700_s0 = sld [smem:[#allocation10_spill]] (%p1937_p3) }
  0x1d   : > { %s1548_s15 = sshll.u32 (%p1937_p3), %s284_s14, 3  ;;  %s282_s22 = scalar_lea.vmem (%p1937_p3), [#allocation2], %s1546_s13 }
  0x22   : > { %s286_s21 = scalar_lea.vmem %s2700_s0, %s1548_s15 }
  0x23   : > { %v321_v0 = vld [vmem:[%s286_s21] sm:$0xff]  ;;  %v323_v1 = vld [vmem:[%s286_s21 + $0x10] sm:$0xff] }
  0x24   : > { %v325_v2 = vld [vmem:[%s286_s21 + $0x20] sm:$0xff]  ;;  %322 = vst [vmem:[%s282_s22] sm:$0xff] %v321_v0  ;;  %v327_v3 = vld [vmem:[%s286_s21 + $0x30] sm:$0xff] }
  0x25   : > { %324 = vst [vmem:[%s282_s22 + $0x8] sm:$0xff] %v323_v1 }
  0x26   : > { %326 = vst [vmem:[%s282_s22 + $0x10] sm:$0xff] %v325_v2 }
  0x27   : > { %328 = vst [vmem:[%s282_s22 + $0x18] sm:$0xff] %v327_v3 }
  0x28 PF: > { %p1549_p12 = scmp.ge.s32.totalorder %s1830_s12, 1  ;;  %p345_p13 = scmp.lt.s32.totalorder %s1830_s12, 5 }
  0x2a   : > { %p346_p0 = pnand %p1549_p12, %p345_p13 }
  0x2b   : > { %s2689_s15 = sand.u32 (!%p346_p0), 1, %s1806_s28   ;;  %p394_p1 = scmp.lt.s32.totalorder (!%p346_p0), %s1818_s9, 1 }
  0x2c   : > { %349 = sbr.rel (%p346_p0) target bundleno = 970 (0x3ca), region = 86  ;;  %s1977_s23 = sshll.u32 (!%p346_p0), %s2689_s15, 5 }
  0x2d   : > { %s354_s17 = scalar_lea.vmem (!%p346_p0), [#allocation2], %s1977_s23  ;;  %p396_p2 = scmp.lt.s32.totalorder (!%p346_p0), %s1814_s30, 1 }
  0x2e   : > { %s1835_s13 = smov (!%p346_p0), 127   ;;  %s1836_s14 = smov (!%p346_p0), 1  }
  0x2f   : > { %s1616_s10 = sshll.u32 (!%p346_p0), %s1818_s9, 3  ;;  %s1756_s0 = scalar_lea.hbm (!%p346_p0), %s2686_s8, 128 }
  0x31   : > { %v444_v4 = vld [vmem:[%s2681_s3 + $0x68] sm:$0xff]  ;;  %v1832_v5 = vmov 0   ;;  %v446_v6 = vld [vmem:[%s2681_s3 + $0x78] sm:$0xff]  ;;  %v405_v9 = vld [vmem:[%s354_s17 + $0x10] sm:$0xff]  ;;  %s395_s18 = scalar_select %p394_p1, %s1818_s9, 1  ;;  %vm575_vm0 = vcmask 261120   ;;  %v737_v48 = vlaneseq }
  0x32   : > { %1708 = vset.pattern.permute.xlu1 %v1832_v5  ;;  %1707 = vset.pattern.permute.xlu0 %v1832_v5  ;;  %v442_v7 = vld [vmem:[%s2681_s3 + $0x58] sm:$0xff]  ;;  %v404_v10 = vld [vmem:[%s354_s17 + $0x8] sm:$0xff]  ;;  %v443_v11 = vld [vmem:[%s2681_s3 + $0x60] sm:$0xff]  ;;  %s397_s26 = scalar_select %p396_p2, %s1814_s30, 1  ;;  %v1833_v24 = vmov 1   ;;  %v1834_v55 = vmov 0.0  }
  0x33   : > { %522 = vperm.xlu1 %1708, %v444_v4   ;;  %532 = vperm.xlu0 %1707, %v446_v6   ;;  %v406_v8 = vld [vmem:[%s354_s17 + $0x18] sm:$0xff]  ;;  %v403_v12 = vld [vmem:[%s354_s17] sm:$0xff]  ;;  %v445_v15 = vld [vmem:[%s2681_s3 + $0x70] sm:$0xff]  ;;  %s1553_s16 = sshll.u32 %s395_s18, 5  ;;  %v2115_v49 = vand.u32 127, %v737_v48  ;;  %vm928_vm4 = vcmask 523264  }
  0x34   : > { %1709 = vset.pattern.permute.xlu2 %v1832_v5  ;;  %660 = vmatpush.msra.mxu0 %v406_v8  ;;  %v407_v13 = vld [vmem:[%s2680_s2] sm:$0xff]  ;;  %v422_v14 = vld [vmem:[%s2680_s2 + $0x78] sm:$0xff]  ;;  %v441_v16 = vld [vmem:[%s2681_s3 + $0x50] sm:$0xff]  ;;  %s1552_s22 = sshll.u32 %s397_s26, 4  ;;  %vm1055_vm9 = vcmask 1043456   ;;  %vm1030_vm10 = vcmask 31744  }
  0x35   : > { %1620 = vmatpush.msra.mxu2 %v406_v8  ;;  %512 = vperm.xlu2 %1709, %v442_v7   ;;  %v439_v17 = vld [vmem:[%s2681_s3 + $0x40] sm:$0xff]  ;;  %s400_s15 = sadd.s32 %s1553_s16, %s1552_s22  ;;  %v408_v18 = vld [vmem:[%s2680_s2 + $0x8] sm:$0xff]  ;;  %v438_v20 = vld [vmem:[%s2681_s3 + $0x38] sm:$0xff]  ;;  %vm778_vm2 = vcmp.eq.s32.totalorder %v2115_v49, 127  ;;  %vm777_vm3 = vcmp.eq.s32.totalorder %v2115_v49, 0  ;;  %s2701_s9 = sand.u32 1, %s1806_s28  }
  0x36   : > { %1621 = vmatpush.msra.mxu3 %v406_v8  ;;  %661 = vmatpush.msra.mxu0 %v405_v9  ;;  %v440_v19 = vld [vmem:[%s2681_s3 + $0x48] sm:$0xff]  ;;  %s1554_s11 = sshll.u32 %s400_s15, 3  ;;  %v409_v22 = vld [vmem:[%s2680_s2 + $0x10] sm:$0xff]  ;;  %v410_v26 = vld [vmem:[%s2680_s2 + $0x18] sm:$0xff]  ;;  %s393_s15 = scalar_lea.vmem [#allocation3], %s1977_s23 }
  0x37   : > { %1622 = vmatpush.msra.mxu2 %v405_v9  ;;  %s2027_s22 = scalar_lea.vmem %s2679_s1, %s1554_s11  ;;  %v437_v23 = vld [vmem:[%s2681_s3 + $0x30] sm:$0xff]  ;;  %v436_v28 = vld [vmem:[%s2681_s3 + $0x28] sm:$0xff]  ;;  %v411_v29 = vld [vmem:[%s2680_s2 + $0x20] sm:$0xff]  ;;  %s1579_s11 = sshll.u32 %s1814_s30, 7 }
  0x38   : > { %1623 = vmatpush.msra.mxu3 %v405_v9  ;;  %662 = vmatpush.msra.mxu0 %v404_v10  ;;  %v766_v21 = vld [vmem:[%s2027_s22 + $0x28] sm:$0xff]  ;;  %v768_v25 = vld [vmem:[%s2027_s22 + $0x38] sm:$0xff]  ;;  %v767_v27 = vld [vmem:[%s2027_s22 + $0x30] sm:$0xff]  ;;  %v740_v50 = vstv %s1579_s11  ;;  %s1432_s11 = sadd.s32 %s1814_s30, %s1616_s10  ;;  %s1422_s30 = scalar_lea.sflag [#allocation4], %s2701_s9 }
  0x39   : > { %1624 = vmatpush.msra.mxu2 %v404_v10  ;;  %v433_v30 = vld [vmem:[%s2681_s3 + $0x10] sm:$0xff]  ;;  %v435_v31 = vld [vmem:[%s2681_s3 + $0x20] sm:$0xff]  ;;  %v412_v32 = vld [vmem:[%s2680_s2 + $0x28] sm:$0xff]  ;;  %v741_v52 = vadd.s32 %v740_v50, %v2115_v49  ;;  %s1617_s17 = sshll.u32 %s1432_s11, 3 }
  0x3a   : > { %1625 = vmatpush.msra.mxu3 %v404_v10  ;;  %663 = vmatpush.msra.mxu0 %v403_v12  ;;  %v434_v33 = vld [vmem:[%s2681_s3 + $0x18] sm:$0xff]  ;;  %v413_v34 = vld [vmem:[%s2680_s2 + $0x30] sm:$0xff]  ;;  %v432_v35 = vld [vmem:[%s2681_s3 + $0x8] sm:$0xff]  ;;  %s1434_s18 = scalar_lea.hbm %s2686_s8, %s1617_s17 }
  0x3b   : > { %517 = vperm.xlu1 %1708, %v443_v11   ;;  %1626 = vmatpush.msra.mxu2 %v403_v12  ;;  %v765_v36 = vld [vmem:[%s2027_s22 + $0x20] sm:$0xff]  ;;  %v414_v37 = vld [vmem:[%s2680_s2 + $0x38] sm:$0xff]  ;;  %v416_v41 = vld [vmem:[%s2680_s2 + $0x48] sm:$0xff]  ;;  %vm742_vm1 = vcmp.lt.s32.totalorder %v741_v52, 200  ;;  %s1437_s23 = sshll.u32 %s1434_s18, 4  ;;  %s1438_s23 = int_to_ptr.hbm [resolvable:$true] %s1437_s23 }
  0x3c   : > { %1555 = vmatmul.msk.f32.vlgmr.msra.gmra.mxu0 %vm575_vm0, %v407_v13  ;;  %1570 = vmatmul.msk.f32.vlgmr.msra.gmra.mxu2 %vm575_vm0, %v422_v14  ;;  %v431_v38 = vld [vmem:[%s2681_s3] sm:$0xff]  ;;  %v764_v39 = vld [vmem:[%s2027_s22 + $0x18] sm:$0xff]  ;;  %v417_v42 = vld [vmem:[%s2680_s2 + $0x50] sm:$0xff]  ;;  %v2120_v56 = vsel %vm742_vm1, 1.0, %v1834_v55 }
  0x3d   : > { %527 = vperm.xlu0 %1707, %v445_v15   ;;  %507 = vperm.xlu2 %1709, %v441_v16   ;;  %v415_v40 = vld [vmem:[%s2680_s2 + $0x40] sm:$0xff]  ;;  %v418_v43 = vld [vmem:[%s2680_s2 + $0x58] sm:$0xff]  ;;  %v763_v45 = vld [vmem:[%s2027_s22 + $0x10] sm:$0xff] }
  0x3e   : > { %1627 = vmatpush.msra.mxu3 %v403_v12  ;;  %v419_v44 = vld [vmem:[%s2680_s2 + $0x60] sm:$0xff]  ;;  %v420_v46 = vld [vmem:[%s2680_s2 + $0x68] sm:$0xff]  ;;  %v421_v47 = vld [vmem:[%s2680_s2 + $0x70] sm:$0xff] }
  0x3f   : > { %v2132_v62 = vld [vmem:[%s2027_s22 + $0x8] sm:$0xff]  ;;  %v423_v13 = vld [vmem:[%s2680_s2 + $0x80] sm:$0xff] }
  0x40   : > { %v427_v14 = vld [vmem:[%s2680_s2 + $0xa0] sm:$0xff]  ;;  %v1349_v49 = vld [vmem:[%s2682_s4 + $0x8] sm:$0xff] }
  0x41   : > { %1575 = vmatmul.msk.f32.vlgmr.msra.gmra.mxu3 %vm575_vm0, %v427_v14 }
  0x43   : > { %497 = vperm.xlu1 %1708, %v439_v17  }
  0x44   : > { %1556 = vmatmul.msk.f32.gmra.mxu0 %vm575_vm0, %v408_v18  ;;  %1571 = vmatmul.msk.f32.gmra.mxu2 %vm575_vm0, %v423_v13 }
  0x45   : > { %502 = vperm.xlu0 %1707, %v440_v19   ;;  %492 = vperm.xlu2 %1709, %v438_v20   ;;  %v424_v19 = vld [vmem:[%s2680_s2 + $0x88] sm:$0xff] }
  0x46   : > { %v428_v20 = vld [vmem:[%s2680_s2 + $0xa8] sm:$0xff] }
  0x49   : > { %1576 = vmatmul.msk.f32.gmra.mxu3 %vm575_vm0, %v428_v20  ;;  %v454_v20 = vld [vmem:[%s2681_s3 + $0xb8] sm:$0xff] }
  0x4b   : > { %1712 = vset.pattern.permute.xlu1 %v1833_v24 }
  0x4c   : > { %884 = vperm.xlu1 %1712, %v766_v21   ;;  %1557 = vmatmul.msk.f32.gmra.mxu0 %vm575_vm0, %v409_v22 }
  0x4d   : > { %487 = vperm.xlu0 %1707, %v437_v23   ;;  %1710 = vset.pattern.permute.xlu2 %v1833_v24 }
  0x4e   : > { %892 = vperm.xlu2 %1710, %v768_v25   ;;  %1572 = vmatmul.msk.f32.gmra.mxu2 %vm575_vm0, %v424_v19 }
  0x54   : > { %1713 = vset.pattern.permute.xlu1 %v1832_v5  ;;  %1558 = vmatmul.msk.f32.gmra.mxu0 %vm575_vm0, %v410_v26 }
  0x55   : > { %829 = vperm.xlu1 %1713, %v767_v27   ;;  %482 = vperm.xlu0 %1707, %v436_v28   ;;  %v429_v28 = vld [vmem:[%s2680_s2 + $0xb0] sm:$0xff] }
  0x56   : > { %888 = vperm.xlu2 %1710, %v767_v27   ;;  %v425_v27 = vld [vmem:[%s2680_s2 + $0x90] sm:$0xff]  ;;  %1577 = vmatmul.msk.f32.gmra.mxu3 %vm575_vm0, %v429_v28 }
  0x57   : > { %1573 = vmatmul.msk.f32.gmra.mxu2 %vm575_vm0, %v425_v27  ;;  %v450_v27 = vld [vmem:[%s2681_s3 + $0x98] sm:$0xff] }
  0x5c   : > { %1559 = vmatmul.msk.f32.gmra.mxu0 %vm575_vm0, %v411_v29 }
  0x5d   : > { %467 = vperm.xlu1 %1713, %v433_v30   ;;  %477 = vperm.xlu0 %1707, %v435_v31  }
  0x5e   : > { %1711 = vset.pattern.permute.xlu2 %v1832_v5 }
  0x5f   : > { %834 = vperm.xlu2 %1711, %v768_v25  }
  0x64   : > { %1560 = vmatmul.msk.f32.gmra.mxu0 %vm575_vm0, %v412_v32 }
  0x65   : > { %824 = vperm.xlu1 %1713, %v766_v21   ;;  %819 = vperm.xlu0 %1707, %v765_v36  }
  0x67   : > { %472 = vperm.xlu2 %1711, %v434_v33   ;;  %v426_v33 = vld [vmem:[%s2680_s2 + $0x98] sm:$0xff] }
  0x68   : > { %1574 = vmatmul.msk.f32.gmra.mxu2 %vm575_vm0, %v426_v33 }
  0x6c   : > { %1561 = vmatmul.msk.f32.gmra.mxu0 %vm575_vm0, %v413_v34  ;;  %v430_v34 = vld [vmem:[%s2680_s2 + $0xb8] sm:$0xff] }
  0x6d   : > { %462 = vperm.xlu1 %1713, %v432_v35   ;;  %814 = vperm.xlu0 %1707, %v764_v39  }
  0x6e   : > { %1578 = vmatmul.msk.f32.gmra.mxu3 %vm575_vm0, %v430_v34 }
  0x6f   : > { %1714 = vset.pattern.permute.xlu2 %v1833_v24 }
  0x70   : > { %872 = vperm.xlu2 %1714, %v763_v45  }
  0x74   : > { %1562 = vmatmul.msk.f32.gmra.mxu0 %vm575_vm0, %v414_v37 }
  0x75   : > { %457 = vperm.xlu1 %1713, %v431_v38   ;;  %1715 = vset.pattern.permute.xlu0 %v1833_v24 }
  0x76   : > { %880 = vperm.xlu0 %1715, %v765_v36  }
  0x78   : > { %868 = vperm.xlu2 %1714, %v2132_v62  }
  0x7c   : > { %1563 = vmatmul.msk.f32.gmra.mxu0 %vm575_vm0, %v415_v40 }
  0x7d   : > { %809 = vperm.xlu1 %1713, %v763_v45  }
  0x7e   : > { %876 = vperm.xlu0 %1715, %v764_v39  }
  0x80   : > { %1716 = vset.pattern.permute.xlu2 %v1832_v5 }
  0x84   : > { %1564 = vmatmul.msk.f32.gmra.mxu0 %vm575_vm0, %v416_v41 }
  0x8c   : > { %1565 = vmatmul.msk.f32.gmra.mxu0 %vm575_vm0, %v417_v42 }
  0x8f   : > { %v513_v1 = vpop.permute.xlu2 %512 }
  0x94   : > { %1566 = vmatmul.msk.f32.gmra.mxu0 %vm575_vm0, %v418_v43 }
  0x97   : > { %v508_v4 = vpop.permute.xlu2 %507 }
  0x9c   : > { %1567 = vmatmul.msk.f32.gmra.mxu0 %vm575_vm0, %v419_v44 }
  0x9f   : > { %v493_v8 = vpop.permute.xlu2 %492 }
  0xa4   : > { %1568 = vmatmul.msk.f32.gmra.mxu0 %vm575_vm0, %v420_v46 }
  0xa5   : > { %v533_v53 = vpop.permute.xlu0 %532  ;;  %v523_v63 = vpop.permute.xlu1 %522 }
  0xa8   : > { %v893_v37 = vpop.permute.xlu2 %892 }
  0xac   : > { %1569 = vmatmul.msk.f32.gmra.mxu0 %vm575_vm0, %v421_v47 }
  0xad   : > { %v518_v2 = vpop.permute.xlu1 %517 }
  0xaf   : > { %v528_v15 = vpop.permute.xlu0 %527 }
  0xb0   : > { %v2198_v43 = vpop.permute.xlu2 %888 }
  0xb5   : > { %v498_v6 = vpop.permute.xlu1 %497 }
  0xb7   : > { %v503_v22 = vpop.permute.xlu0 %502 }
  0xb9   : > { %v2117_v51 = vpop.f32.mrf.mxu0 }
  0xbe   : > { %v2144_v11 = vpop.permute.xlu1 %884 }
  0xbf   : > { %v710_v54 = vpop.f32.mrf.mxu2  ;;  %v488_v40 = vpop.permute.xlu0 %487 }
  0xc0   : > { %v711_v57 = vadd.f32 %v710_v54, %v533_v53  ;;  %v835_v53 = vpop.permute.xlu2 %834 }
  0xc1   : > { %v2122_v58 = vpop.f32.mrf.mxu0 }
  0xc2   : > { %v752_v59 = vmul.f32 %v2120_v56, %v711_v57 }
  0xc4   : > { %859 = vrot.lane.b32.xlu1 %v752_v59, %s1835_s13 }
  0xc7   : > { %v2164_v21 = vpop.permute.xlu1 %829  ;;  %v483_v47 = vpop.permute.xlu0 %482 }
  0xc9   : > { %v2126_v60 = vpop.f32.mrf.mxu0 }
  0xcc   : > { %793 = vrot.lane.b32.xlu1 %v752_v59, %s1836_s14 }
  0xcf   : > { %v468_v29 = vpop.permute.xlu1 %467 }
  0xd0   : > { %v2228_v13 = vadd.f32 %v2126_v60, %v468_v29  ;;  %v2279_v29 = vld [vmem:[%s2027_s22 + $0x78] sm:$0xff] }
  0xd1   : > { %v2129_v61 = vpop.f32.mrf.mxu0 }
  0xd7   : > { %v2194_v35 = vpop.permute.xlu1 %824 }
  0xd9   : > { %v2135_v0 = vpop.f32.mrf.mxu0 }
  0xdf   : > { %v463_v42 = vpop.permute.xlu1 %462 }
  0xe1   : > { %v2138_v3 = vpop.f32.mrf.mxu0 }
  0xe7   : > { %v458_v52 = vpop.permute.xlu1 %457 }
  0xe9   : > { %v2140_v7 = vpop.f32.mrf.mxu0 }
  0xea   : > { %v2206_v57 = vadd.f32 %v2140_v7, %v488_v40 }
  0xf1   : > { %v686_v9 = vpop.f32.mrf.mxu0 }
  0xf2   : > { %v2142_v10 = vadd.f32 %v686_v9, %v493_v8 }
  0xf4   : > { %v918_v12 = vmul.f32 %v752_v59, %v2142_v10 }
  0xf6   : > { %960 = vmatpush.msrb.mxu2 %v918_v12  ;;  %v761_v12 = vld [vmem:[%s2027_s22] sm:$0xff] }
  0xf9   : > { %v689_v16 = vpop.f32.mrf.mxu0 }
  0xfa   : > { %v690_v17 = vadd.f32 %v689_v16, %v498_v6  ;;  %v473_v6 = vpop.permute.xlu2 %472  ;;  %v2242_v16 = vadd.f32 %v2117_v51, %v458_v52 }
  0xfc   : > { %v2156_v18 = vmul.f32 %v2120_v56, %v690_v17 }
  0xfe   : > { %845 = vrot.lane.b32.xlu2 %v2156_v18, %s1835_s13 }
 0x101   : > { %v692_v23 = vpop.f32.mrf.mxu0 }
 0x102   : > { %v693_v25 = vadd.f32 %v692_v23, %v503_v22  ;;  %v873_v28 = vpop.permute.xlu2 %872 }
 0x104   : > { %v2171_v26 = vmul.f32 %v2120_v56, %v693_v25  ;;  %v453_v25 = vld [vmem:[%s2681_s3 + $0xb0] sm:$0xff] }
 0x106   : > { %847 = vrot.lane.b32.xlu1 %v2171_v26, %s1835_s13 }
 0x109   : > { %v695_v30 = vpop.f32.mrf.mxu0 }
 0x10a   : > { %v696_v31 = vadd.f32 %v695_v30, %v508_v4  ;;  %v447_v30 = vld [vmem:[%s2681_s3 + $0x80] sm:$0xff] }
 0x10c   : > { %v747_v32 = vmul.f32 %v2120_v56, %v696_v31  ;;  %v869_v31 = vpop.permute.xlu2 %868 }
 0x10e   : > { %783 = vrot.lane.b32.xlu0 %v747_v32, %s1836_s14  ;;  %849 = vrot.lane.b32.xlu1 %v747_v32, %s1835_s13 }
 0x111   : > { %v698_v36 = vpop.f32.mrf.mxu0 }
 0x112   : > { %v699_v38 = vadd.f32 %v698_v36, %v513_v1  ;;  %v2209_v1 = vpop.permute.xlu1 %809 }
 0x114   : > { %v748_v39 = vmul.f32 %v2120_v56, %v699_v38 }
 0x116   : > { %851 = vrot.lane.b32.xlu2 %v748_v39, %s1835_s13 }
 0x119   : > { %v701_v41 = vpop.f32.mrf.mxu0 }
 0x11a   : > { %v702_v44 = vadd.f32 %v701_v41, %v518_v2  ;;  %v2212_v2 = vadd.f32 %v2138_v3, %v483_v47  ;;  %v2224_v3 = vadd.f32 %v2129_v61, %v473_v6  ;;  %v913_v61 = vmul.f32 %v747_v32, %v2228_v13 }
 0x11c   : > { %v749_v48 = vmul.f32 %v2120_v56, %v702_v44  ;;  %v914_v14 = vmul.f32 %v748_v39, %v2224_v3 }
 0x11e   : > { %785 = vrot.lane.b32.xlu2 %v748_v39, %s1836_s14 }
 0x121   : > { %v704_v45 = vpop.f32.mrf.mxu0 }
 0x122   : > { %v705_v46 = vadd.f32 %v704_v45, %v523_v63  ;;  %v478_v63 = vpop.permute.xlu0 %477  ;;  %v2293_v45 = vpop.f32.mrf.mxu3 }
 0x123   : > { %v2219_v7 = vadd.f32 %v2135_v0, %v478_v63  ;;  %v2235_v0 = vadd.f32 %v2122_v58, %v463_v42  ;;  %v911_v58 = vmul.f32 %v2156_v18, %v2242_v16  ;;  %v2289_v42 = vld [vmem:[%s2684_s6] sm:$0xf] }
 0x124   : > { %v750_v50 = vmul.f32 %v2120_v56, %v705_v46 }
 0x125   : > { %v915_v9 = vmul.f32 %v749_v48, %v2219_v7  ;;  %v912_v17 = vmul.f32 %v2171_v26, %v2235_v0 }
 0x126   : > { %855 = vrot.lane.b32.xlu0 %v750_v50, %s1835_s13  ;;  %853 = vrot.lane.b32.xlu2 %v749_v48, %s1835_s13  ;;  %v916_v8 = vmul.f32 %v750_v50, %v2212_v2 }
 0x129   : > { %v707_v54 = vpop.f32.mrf.mxu0 }
 0x12a   : > { %v708_v55 = vadd.f32 %v707_v54, %v528_v15  ;;  %v820_v32 = vpop.permute.xlu0 %819 }
 0x12c   : > { %v751_v59 = vmul.f32 %v2120_v56, %v708_v55 }
 0x12e   : > { %791 = vrot.lane.b32.xlu0 %v751_v59, %s1836_s14  ;;  %857 = vrot.lane.b32.xlu1 %v751_v59, %s1835_s13  ;;  %v917_v4 = vmul.f32 %v751_v59, %v2206_v57 }
 0x12f   : > { %787 = vrot.lane.b32.xlu2 %v749_v48, %s1836_s14 }
 0x130   : > { %961 = vmatpush.msrb.mxu2 %v917_v4 }
 0x132   : > { %962 = vmatpush.msrb.mxu2 %v916_v8  ;;  %v815_v36 = vpop.permute.xlu0 %814 }
 0x134   : > { %963 = vmatpush.msrb.mxu2 %v915_v9 }
 0x136   : > { %864 = vperm.xlu0 %1715, %v761_v12   ;;  %781 = vrot.lane.b32.xlu1 %v2171_v26, %s1836_s14  ;;  %v860_v15 = vpop.permute.xlu1 %859  ;;  %v449_v26 = vld [vmem:[%s2681_s3 + $0x90] sm:$0xff] }
 0x137   : > { %789 = vrot.lane.b32.xlu2 %v750_v50, %s1836_s14  ;;  %964 = vmatpush.msrb.mxu2 %v914_v14  ;;  %v902_v60 = vsel %vm778_vm2, %v893_v37, %v860_v15  ;;  %v2295_v50 = vpop.f32.mrf.mxu3 }
 0x138   : > { %v926_v19 = vmul.f32 %v902_v60, %v2142_v10 }
 0x139   : > { %965 = vmatpush.msrb.mxu2 %v913_v61 }
 0x13a   : > { %980 = vmatpush.msrb.mxu3 %v926_v19  ;;  %v881_v37 = vpop.permute.xlu0 %880 }
 0x13b   : > { %966 = vmatpush.msrb.mxu2 %v912_v17  ;;  %v2328_v17 = vpop.f32.mrf.mxu2 }
 0x13d   : > { %967 = vmatpush.msrb.mxu2 %v911_v58 }
 0x13e   : > { %1717 = vset.pattern.permute.xlu0 %v1832_v5  ;;  %779 = vrot.lane.b32.xlu1 %v2156_v18, %s1836_s14  ;;  %v794_v51 = vpop.permute.xlu1 %793  ;;  %v448_v18 = vld [vmem:[%s2681_s3 + $0x88] sm:$0xff] }
 0x13f   : > { %804 = vperm.xlu2 %1716, %v2132_v62   ;;  %572 = vperm.xlu0 %1717, %v454_v20   ;;  %v844_v22 = vsel %vm777_vm3, %v835_v53, %v794_v51  ;;  %v451_v62 = vld [vmem:[%s2681_s3 + $0xa0] sm:$0xff]  ;;  %v731_v14 = vpop.f32.mrf.mxu3 }
 0x140   : > { %v910_v23 = vmul.f32 %v844_v22, %v2142_v10  ;;  %v452_v10 = vld [vmem:[%s2681_s3 + $0xa8] sm:$0xff]  ;;  %1582 = vmatmul.msk.f32.vlgmr.msrb.gmra.mxu2 %vm928_vm4, %v2289_v42 }
 0x142   : > { %940 = vmatpush.msra.mxu1 %v910_v23  ;;  %v877_v39 = vpop.permute.xlu0 %876 }
 0x146   : > { %567 = vperm.xlu1 %1713, %v453_v25  }
 0x147   : > { %799 = vperm.xlu2 %1716, %v761_v12   ;;  %547 = vperm.xlu0 %1717, %v449_v26  }
 0x14e   : > { %557 = vperm.xlu1 %1713, %v451_v62  }
 0x14f   : > { %562 = vperm.xlu2 %1716, %v452_v10   ;;  %v734_v10 = vpop.f32.mrf.mxu3 }
 0x156   : > { %542 = vperm.xlu1 %1713, %v448_v18  }
 0x157   : > { %552 = vperm.xlu2 %1716, %v450_v27  }
 0x158   : > { %v846_v33 = vpop.permute.xlu2 %845 }
 0x15e   : > { %1241 = vperm.xlu1 %1713, %v2279_v29  }
 0x15f   : > { %537 = vperm.xlu2 %1716, %v447_v30  }
 0x167   : > { %1718 = vset.pattern.permute.xlu2 %v1833_v24 }
 0x170   : > { %v852_v34 = vpop.permute.xlu2 %851 }
 0x171   : > { %v898_v12 = vsel %vm778_vm2, %v877_v39, %v852_v34  ;;  %v774_v39 = vld [vmem:[%s2027_s22 + $0x68] sm:$0xff] }
 0x172   : > { %v922_v51 = vmul.f32 %v898_v12, %v2224_v3 }
 0x178   : > { %v786_v38 = vpop.permute.xlu2 %785  ;;  %v848_v41 = vpop.permute.xlu1 %847 }
 0x180   : > { %v854_v40 = vpop.permute.xlu2 %853  ;;  %v784_v44 = vpop.permute.xlu0 %783 }
 0x181   : > { %v850_v47 = vpop.permute.xlu1 %849  ;;  %v899_v9 = vsel %vm778_vm2, %v881_v37, %v854_v40  ;;  %v839_v60 = vsel %vm777_vm3, %v2209_v1, %v784_v44 }
 0x182   : > { %v923_v61 = vmul.f32 %v899_v9, %v2219_v7  ;;  %v905_v1 = vmul.f32 %v839_v60, %v2228_v13 }
 0x189   : > { %v788_v46 = vpop.permute.xlu2 %787 }
 0x191   : > { %v790_v52 = vpop.permute.xlu2 %789 }
 0x192   : > { %v842_v55 = vsel %vm777_vm3, %v2194_v35, %v790_v52  ;;  %v841_v35 = vsel %vm777_vm3, %v820_v32, %v788_v46  ;;  %v772_v52 = vld [vmem:[%s2027_s22 + $0x58] sm:$0xff] }
 0x193   : > { %v907_v15 = vmul.f32 %v841_v35, %v2219_v7  ;;  %v896_v7 = vsel %vm778_vm2, %v869_v31, %v848_v41 }
 0x198   : > { %v856_v48 = vpop.permute.xlu0 %855 }
 0x199   : > { %v900_v59 = vsel %vm778_vm2, %v2144_v11, %v856_v48  ;;  %v908_v11 = vmul.f32 %v842_v55, %v2212_v2 }
 0x1a0   : > { %v792_v53 = vpop.permute.xlu0 %791  ;;  %v858_v54 = vpop.permute.xlu1 %857 }
 0x1a1   : > { %v843_v63 = vsel %vm777_vm3, %v2164_v21, %v792_v53  ;;  %v901_v4 = vsel %vm778_vm2, %v2198_v43, %v858_v54  ;;  %v924_v21 = vmul.f32 %v900_v59, %v2212_v2  ;;  %v840_v43 = vsel %vm777_vm3, %v815_v36, %v786_v38  ;;  %v770_v59 = vld [vmem:[%s2027_s22 + $0x48] sm:$0xff] }
 0x1a2   : > { %v909_v6 = vmul.f32 %v843_v63, %v2206_v57  ;;  %v925_v8 = vmul.f32 %v901_v4, %v2206_v57  ;;  %v805_v57 = vpop.permute.xlu2 %804  ;;  %v897_v2 = vsel %vm778_vm2, %v873_v28, %v850_v47  ;;  %v906_v20 = vmul.f32 %v840_v43, %v2224_v3  ;;  %v716_v28 = vpop.f32.mrf.mxu2  ;;  %v771_v63 = vld [vmem:[%s2027_s22 + $0x50] sm:$0xff] }
 0x1a3   : > { %v921_v23 = vmul.f32 %v897_v2, %v2228_v13  ;;  %v920_v3 = vmul.f32 %v896_v7, %v2235_v0 }
 0x1a4   : > { %941 = vmatpush.msra.mxu1 %v909_v6  ;;  %981 = vmatpush.msrb.mxu3 %v925_v8 }
 0x1a6   : > { %942 = vmatpush.msra.mxu1 %v908_v11  ;;  %982 = vmatpush.msrb.mxu3 %v924_v21  ;;  %v769_v21 = vld [vmem:[%s2027_s22 + $0x40] sm:$0xff] }
 0x1a8   : > { %v865_v19 = vpop.permute.xlu0 %864  ;;  %v782_v58 = vpop.permute.xlu1 %781  ;;  %943 = vmatpush.msra.mxu1 %v907_v15  ;;  %983 = vmatpush.msrb.mxu3 %v923_v61 }
 0x1a9   : > { %v838_v22 = vsel %vm777_vm3, %v805_v57, %v782_v58  ;;  %v895_v25 = vsel %vm778_vm2, %v865_v19, %v846_v33 }
 0x1aa   : > { %944 = vmatpush.msra.mxu1 %v906_v20  ;;  %984 = vmatpush.msrb.mxu3 %v922_v51  ;;  %v904_v26 = vmul.f32 %v838_v22, %v2235_v0  ;;  %v919_v62 = vmul.f32 %v895_v25, %v2242_v16  ;;  %v800_v18 = vpop.permute.xlu2 %799  ;;  %v719_v36 = vpop.f32.mrf.mxu2 }
 0x1ac   : > { %945 = vmatpush.msra.mxu1 %v905_v1  ;;  %985 = vmatpush.msrb.mxu3 %v921_v23 }
 0x1ae   : > { %946 = vmatpush.msra.mxu1 %v904_v26  ;;  %986 = vmatpush.msrb.mxu3 %v920_v3 }
 0x1b0   : > { %v780_v27 = vpop.permute.xlu1 %779  ;;  %987 = vmatpush.msrb.mxu3 %v919_v62 }
 0x1b1   : > { %v837_v13 = vsel %vm777_vm3, %v800_v18, %v780_v27  ;;  %v573_v30 = vpop.permute.xlu0 %572  ;;  %1583 = vmatmul.msk.f32.vlgmr.msrb.gmra.mxu3 %vm928_vm4, %v2289_v42 }
 0x1b2   : > { %v735_v31 = vadd.f32 %v734_v10, %v573_v30  ;;  %v903_v0 = vmul.f32 %v837_v13, %v2242_v16  ;;  %v563_v37 = vpop.permute.xlu2 %562  ;;  %v775_v16 = vld [vmem:[%s2027_s22 + $0x70] sm:$0xff]  ;;  %v722_v47 = vpop.f32.mrf.mxu2  ;;  %v1022_v30 = vld [vmem:[%s2685_s7] sm:$0xff] }
 0x1b3   : > { %v729_v40 = vadd.f32 %v2295_v50, %v563_v37  ;;  %v1027_v37 = vld [vmem:[%s2685_s7 + $0x28] sm:$0xff] }
 0x1b4   : > { %v2349_v32 = vmul.f32 %v2120_v56, %v735_v31  ;;  %947 = vmatpush.msra.mxu1 %v903_v0  ;;  %v1023_v31 = vld [vmem:[%s2685_s7 + $0x8] sm:$0xff]  ;;  %v1024_v0 = vld [vmem:[%s2685_s7 + $0x10] sm:$0xff] }
 0x1b5   : > { %1581 = vmatmul.msk.f32.vlgmr.msra.gmra.mxu1 %vm928_vm4, %v2289_v42  ;;  %v2370_v46 = vmul.f32 %v2120_v56, %v729_v40 }
 0x1b6   : > { %1202 = vrot.lane.b32.xlu0 %v2349_v32, %s1836_s14  ;;  %1266 = vrot.lane.b32.xlu1 %v2349_v32, %s1835_s13 }
 0x1b8   : > { %v568_v33 = vpop.permute.xlu1 %567 }
 0x1b9   : > { %v732_v34 = vadd.f32 %v731_v14, %v568_v33  ;;  %v548_v53 = vpop.permute.xlu0 %547  ;;  %v1025_v33 = vld [vmem:[%s2685_s7 + $0x18] sm:$0xff] }
 0x1ba   : > { %v553_v48 = vpop.permute.xlu2 %552  ;;  %v720_v54 = vadd.f32 %v719_v36, %v548_v53 }
 0x1bb   : > { %v2358_v38 = vmul.f32 %v2120_v56, %v732_v34  ;;  %v723_v50 = vadd.f32 %v722_v47, %v553_v48  ;;  %v1026_v34 = vld [vmem:[%s2685_s7 + $0x20] sm:$0xff] }
 0x1bc   : > { %v2392_v55 = vmul.f32 %v2120_v56, %v720_v54  ;;  %v1353_v54 = vld [vmem:[%s2683_s5 + $0x8] sm:$0xff] }
 0x1bd   : > { %1200 = vrot.lane.b32.xlu2 %v2358_v38, %s1836_s14 }
 0x1be   : > { %1236 = vperm.xlu0 %1717, %v775_v16   ;;  %1231 = vperm.xlu1 %1713, %v774_v39  }
 0x1c0   : > { %v558_v41 = vpop.permute.xlu1 %557 }
 0x1c1   : > { %v726_v42 = vadd.f32 %v2293_v45, %v558_v41  ;;  %v2378_v45 = vmul.f32 %v2120_v56, %v723_v50  ;;  %v1028_v41 = vld [vmem:[%s2685_s7 + $0x30] sm:$0xff]  ;;  %v1029_v50 = vld [vmem:[%s2685_s7 + $0x38] sm:$0xff] }
 0x1c2   : > { %v538_v4 = vpop.permute.xlu2 %537 }
 0x1c3   : > { %v2367_v44 = vmul.f32 %v2120_v56, %v726_v42  ;;  %v714_v8 = vadd.f32 %v2328_v17, %v538_v4  ;;  %v1355_v4 = vld [vmem:[%s2683_s5 + $0x18] sm:$0xff] }
 0x1c5   : > { %1297 = vperm.xlu2 %1718, %v2279_v29   ;;  %v773_v29 = vld [vmem:[%s2027_s22 + $0x60] sm:$0xff]  ;;  %v2408_v35 = vmul.f32 %v2120_v56, %v714_v8  ;;  %s1435_s22 = sshll.u32 %s393_s15, 4  ;;  %s1436_s22 = int_to_ptr.vmem [resolvable:$true] %s1435_s22 }
 0x1c6   : > { %1196 = vrot.lane.b32.xlu1 %v2367_v44, %s1836_s14  ;;  %1198 = vrot.lane.b32.xlu0 %v2370_v46, %s1836_s14 }
 0x1c8   : > { %v543_v6 = vpop.permute.xlu1 %542 }
 0x1c9   : > { %v717_v9 = vadd.f32 %v716_v28, %v543_v6 }
 0x1cb   : > { %v2411_v11 = vmul.f32 %v2120_v56, %v717_v9  ;;  %v969_v56 = vpop.f32.mrf.mxu2 }
 0x1cd   : > { %1264 = vrot.lane.b32.xlu2 %v2358_v38, %s1835_s13 }
 0x1ce   : > { %1262 = vrot.lane.b32.xlu1 %v2370_v46, %s1835_s13  ;;  %1194 = vrot.lane.b32.xlu0 %v2378_v45, %s1836_s14 }
 0x1cf   : > { %1719 = vset.pattern.permute.xlu2 %v1832_v5 }
 0x1d5   : > { %1226 = vperm.xlu2 %1719, %v773_v29  }
 0x1d6   : > { %1221 = vperm.xlu1 %1713, %v772_v52   ;;  %1258 = vrot.lane.b32.xlu0 %v2378_v45, %s1835_s13 }
 0x1dd   : > { %1720 = vset.pattern.permute.xlu2 %v1833_v24 }
 0x1de   : > { %1289 = vperm.xlu2 %1720, %v774_v39   ;;  %1192 = vrot.lane.b32.xlu1 %v2392_v55, %s1836_s14 }
 0x1df   : > { %1211 = vperm.xlu0 %1717, %v770_v59   ;;  %1722 = vset.pattern.permute.xlu1 %v1833_v24 }
 0x1e6   : > { %1260 = vrot.lane.b32.xlu2 %v2367_v44, %s1835_s13  ;;  %1281 = vperm.xlu1 %1722, %v772_v52  }
 0x1e7   : > { %1723 = vset.pattern.permute.xlu0 %v1833_v24  ;;  %1721 = vset.pattern.permute.xlu2 %v1832_v5 }
 0x1e8   : > { %1293 = vperm.xlu0 %1723, %v775_v16   ;;  %v2462_v16 = vpop.permute.xlu1 %1241 }
 0x1ee   : > { %1216 = vperm.xlu2 %1721, %v771_v63   ;;  %1256 = vrot.lane.b32.xlu1 %v2392_v55, %s1835_s13 }
 0x1f0   : > { %1285 = vperm.xlu0 %1723, %v773_v29  }
 0x1f6   : > { %1190 = vrot.lane.b32.xlu2 %v2411_v11, %s1836_s14  ;;  %1188 = vrot.lane.b32.xlu1 %v2408_v35, %s1836_s14 }
 0x1f7   : > { %1724 = vset.pattern.permute.xlu2 %v1833_v24 }
 0x1f8   : > { %1254 = vrot.lane.b32.xlu0 %v2411_v11, %s1835_s13 }
 0x1fe   : > { %1277 = vperm.xlu2 %1724, %v771_v63   ;;  %1273 = vperm.xlu1 %1722, %v770_v59  }
 0x200   : > { %1269 = vperm.xlu0 %1723, %v769_v21  }
 0x206   : > { %1725 = vset.pattern.permute.xlu2 %v1832_v5  ;;  %1726 = vset.pattern.permute.xlu1 %v1832_v5 }
 0x207   : > { %1206 = vperm.xlu2 %1725, %v769_v21  }
 0x208   : > { %1727 = vset.pattern.permute.xlu0 %v1832_v5 }
 0x20f   : > { %1252 = vrot.lane.b32.xlu2 %v2408_v35, %s1835_s13  ;;  %s1750_s13 = sshra.s32 %s1438_s23, 4  ;;  %s1751_s13 = int_to_ptr.hbm [resolvable:$true] %s1750_s13 }
 0x210   : > { %s1752_s14 = scalar_lea.hbm %s1751_s13, 32  ;;  %p1757_p6 = scmp.lt.s32.totalorder %s1751_s13, %s2686_s8 }
 0x211   : > { %p1753_p3 = scmp.ne.s32.totalorder %s1751_s13, %s1752_s14  ;;  %p1758_p7 = scmp.lt.s32.totalorder %s1756_s0, %s1752_s14 }
 0x213   : > { %p1754_p4 = pnand %p1753_p3, %p1945_p8  ;;  %p1759_p10 = por %p1758_p7, %p1757_p6 }
 0x215   : > { %p1755_p5 = pneg %p1754_p4 }
 0x217   : > { %v2454_v36 = vpop.permute.xlu2 %1200  ;;  %1363 = vperm.xlu2 %1725, %v1353_v54   ;;  %p1760_p11 = pnand %p1759_p10, %p1755_p5 }
 0x21f   : > { %v2468_v40 = vpop.permute.xlu2 %1297  ;;  %1373 = vperm.xlu2 %1725, %v1355_v4  }
 0x227   : > { %v2480_v48 = vpop.permute.xlu2 %1264 }
 0x228   : > { %v2464_v39 = vpop.permute.xlu0 %1202  ;;  %v2474_v42 = vpop.permute.xlu1 %1266 }
 0x22f   : > { %v2492_v53 = vpop.permute.xlu2 %1226 }
 0x230   : > { %v2478_v47 = vpop.permute.xlu0 %1236  ;;  %v2488_v29 = vpop.permute.xlu1 %1231 }
 0x232   : > { %v949_v12 = vpop.f32.mrf.mxu1 }
 0x233   : > { %v992_v24 = vmax.f32 %v949_v12, %v969_v56 }
 0x234   : > { %v989_v43 = vpop.f32.mrf.mxu3 }
 0x235   : > { %v993_v14 = vmax.f32 %v992_v24, %v989_v43 }
 0x237   : > { %v994_v57 = vsub.f32 %v949_v12, %v993_v14  ;;  %v997_v15 = vsub.f32 %v969_v56, %v993_v14  ;;  %v1000_v61 = vsub.f32 %v989_v43, %v993_v14 }
 0x238   : > { %v2490_v52 = vpop.permute.xlu0 %1198  ;;  %v2497_v59 = vpop.permute.xlu1 %1196 }
 0x239   : > { %v995_v60 = vmul.f32 1.442695, %v994_v57  ;;  %v998_v2 = vmul.f32 1.442695, %v997_v15  ;;  %v1001_v17 = vmul.f32 1.442695, %v1000_v61  ;;  %v2504_v6 = vpop.permute.xlu2 %1289 }
 0x23b   : > { %1728 = vpow2.f32 %v995_v60 }
 0x23c   : > { %1730 = vpow2.f32 %v998_v2 }
 0x23d   : > { %1732 = vpow2.f32 %v1001_v17 }
 0x240   : > { %v2499_v63 = vpop.permute.xlu0 %1194  ;;  %v2506_v8 = vpop.permute.xlu1 %1262 }
 0x241   : > { %v1729_v19 = vpop.eup %1728  ;;  %v2510_v21 = vpop.permute.xlu2 %1260 }
 0x242   : > { %v1731_v58 = vpop.eup %1730 }
 0x243   : > { %v1003_v5 = vadd.f32 %v1731_v58, %v1729_v19  ;;  %v1733_v20 = vpop.eup %1732 }
 0x245   : > { %v1004_v51 = vadd.f32 %v1733_v20, %v1003_v5 }
 0x247   : > { %1734 = vrcp.f32 %v1004_v51  ;;  %v1016_v23 = vand.u32 2147483648, %v1004_v51  ;;  %v1014_v26 = vand.u32 2147483647, %v1004_v51  ;;  %vm1010_vm6 = vweird.f32 %v1004_v51 }
 0x248   : > { %v2508_v9 = vpop.permute.xlu0 %1258  ;;  %v2512_v56 = vpop.permute.xlu1 %1221 }
 0x249   : > { %v1017_v62 = vor.u32 1.1754944e-38, %v1016_v23  ;;  %vm1015_vm8 = vcmp.eq.f32.partialorder %v1014_v26, 8.507059e+37  ;;  %v2516_v24 = vpop.permute.xlu2 %1216 }
 0x24d   : > { %v1735_v7 = vpop.eup %1734 }
 0x24e   : > { %v1006_v22 = vmul.f32 %v1735_v7, %v1004_v51  ;;  %vm1011_vm5 = vweird.f32 %v1735_v7 }
 0x24f   : > { %vm1012_vm7 = vmor %vm1010_vm6, %vm1011_vm5 }
 0x250   : > { %v1007_v1 = vsub.f32 1.0, %v1006_v22  ;;  %v2518_v43 = vpop.permute.xlu1 %1192 }
 0x251   : > { %v2514_v12 = vpop.permute.xlu0 %1211  ;;  %v2520_v57 = vpop.permute.xlu2 %1190 }
 0x252   : > { %v1008_v25 = vmul.f32 %v1735_v7, %v1007_v1 }
 0x254   : > { %v1009_v3 = vadd.f32 %v1735_v7, %v1008_v25 }
 0x256   : > { %v1013_v10 = vsel %vm1012_vm7, %v1735_v7, %v1009_v3 }
 0x257   : > { %v1018_v18 = vsel %vm1015_vm8, %v1017_v62, %v1013_v10 }
 0x258   : > { %v1019_v27 = vmul.f32 %v1729_v19, %v1018_v18  ;;  %v1020_v28 = vmul.f32 %v1731_v58, %v1018_v18  ;;  %v1021_v13 = vmul.f32 %v1733_v20, %v1018_v18  ;;  %v2522_v15 = vpop.permute.xlu1 %1281 }
 0x259   : > { %v2526_v60 = vpop.permute.xlu2 %1277 }
 0x25a   : > { %1584 = vmatpush.msk.msrb.mxu1 %vm1055_vm9, %v1019_v27  ;;  %1593 = vmatpush.msk.msra.mxu2 %vm1055_vm9, %v1020_v28  ;;  %v1294_v14 = vpop.permute.xlu0 %1293 }
 0x25b   : > { %1602 = vmatpush.msk.msra.mxu3 %vm1055_vm9, %v1021_v13  ;;  %1585 = vmatmul.msk.f32.vlgmr.msrb.gmra.mxu1 %vm1030_vm10, %v1022_v30 }
 0x25c   : > { %1594 = vmatmul.msk.f32.vlgmr.msra.gmra.mxu2 %vm1030_vm10, %v1022_v30  ;;  %1603 = vmatmul.msk.f32.vlgmr.msra.gmra.mxu3 %vm1030_vm10, %v1022_v30 }
 0x260   : > { %v2528_v2 = vpop.permute.xlu1 %1256 }
 0x261   : > { %v1207_v19 = vpop.permute.xlu2 %1206 }
 0x262   : > { %v2524_v61 = vpop.permute.xlu0 %1285 }
 0x263   : > { %1586 = vmatmul.msk.f32.gmra.mxu1 %vm1030_vm10, %v1023_v31 }
 0x264   : > { %1595 = vmatmul.msk.f32.gmra.mxu2 %vm1030_vm10, %v1023_v31  ;;  %1604 = vmatmul.msk.f32.gmra.mxu3 %vm1030_vm10, %v1023_v31 }
 0x268   : > { %v1189_v5 = vpop.permute.xlu1 %1188 }
 0x269   : > { %v1244_v51 = vsel %vm777_vm3, %v1207_v19, %v1189_v5  ;;  %v1253_v1 = vpop.permute.xlu2 %1252 }
 0x26a   : > { %v2530_v17 = vpop.permute.xlu0 %1254 }
 0x26b   : > { %1587 = vmatmul.msk.f32.gmra.mxu1 %vm1030_vm10, %v1024_v0 }
 0x26c   : > { %1596 = vmatmul.msk.f32.gmra.mxu2 %vm1030_vm10, %v1024_v0  ;;  %1605 = vmatmul.msk.f32.gmra.mxu3 %vm1030_vm10, %v1024_v0 }
 0x272   : > { %v1270_v20 = vpop.permute.xlu0 %1269 }
 0x273   : > { %1588 = vmatmul.msk.f32.gmra.mxu1 %vm1030_vm10, %v1025_v33  ;;  %v1300_v3 = vsel %vm778_vm2, %v1270_v20, %v1253_v1 }
 0x274   : > { %1597 = vmatmul.msk.f32.gmra.mxu2 %vm1030_vm10, %v1025_v33  ;;  %1606 = vmatmul.msk.f32.gmra.mxu3 %vm1030_vm10, %v1025_v33 }
 0x27b   : > { %1589 = vmatmul.msk.f32.gmra.mxu1 %vm1030_vm10, %v1026_v34 }
 0x27c   : > { %1598 = vmatmul.msk.f32.gmra.mxu2 %vm1030_vm10, %v1026_v34  ;;  %1607 = vmatmul.msk.f32.gmra.mxu3 %vm1030_vm10, %v1026_v34 }
 0x283   : > { %1590 = vmatmul.msk.f32.gmra.mxu1 %vm1030_vm10, %v1027_v37 }
 0x284   : > { %1599 = vmatmul.msk.f32.gmra.mxu2 %vm1030_vm10, %v1027_v37  ;;  %1608 = vmatmul.msk.f32.gmra.mxu3 %vm1030_vm10, %v1027_v37 }
 0x28b   : > { %1591 = vmatmul.msk.f32.gmra.mxu1 %vm1030_vm10, %v1028_v41 }
 0x28c   : > { %1600 = vmatmul.msk.f32.gmra.mxu2 %vm1030_vm10, %v1028_v41  ;;  %1609 = vmatmul.msk.f32.gmra.mxu3 %vm1030_vm10, %v1028_v41 }
 0x293   : > { %1592 = vmatmul.msk.f32.gmra.mxu1 %vm1030_vm10, %v1029_v50 }
 0x294   : > { %1601 = vmatmul.msk.f32.gmra.mxu2 %vm1030_vm10, %v1029_v50  ;;  %1610 = vmatmul.msk.f32.gmra.mxu3 %vm1030_vm10, %v1029_v50 }
 0x2d8   : > { %v1082_v58 = vpop.f32.mrf.mxu1 }
 0x2d9   : > { %v1308_v23 = vmul.f32 %v1244_v51, %v1082_v58 }
 0x2df   : > { %v1123_v7 = vpop.f32.mrf.mxu2  ;;  %v1164_v22 = vpop.f32.mrf.mxu3 }
 0x2e0   : > { %v1316_v25 = vmul.f32 %v1123_v7, %v2408_v35  ;;  %v2535_v26 = vpop.f32.mrf.mxu1  ;;  %v1332_v10 = vmul.f32 %v1300_v3, %v1164_v22  ;;  %v1250_v7 = vsel %vm777_vm3, %v2478_v47, %v2454_v36  ;;  %v1251_v22 = vsel %vm777_vm3, %v2462_v16, %v2464_v39 }
 0x2e1   : > { %v1249_v16 = vsel %vm777_vm3, %v2488_v29, %v2490_v52  ;;  %v1307_v39 = vsel %vm778_vm2, %v2468_v40, %v2474_v42  ;;  %v1305_v42 = vsel %vm778_vm2, %v2504_v6, %v2506_v8 }
 0x2e2   : > { %v1324_v62 = vadd.f32 %v1316_v25, %v1308_v23  ;;  %v1352_v25 = vld [vmem:[%s2683_s5] sm:$0xff] }
 0x2e3   : > { %1358 = vperm.xlu1 %1726, %v1352_v25  }
 0x2e4   : > { %v2539_v18 = vadd.f32 %v1332_v10, %v1324_v62 }
 0x2e7   : > { %v1126_v27 = vpop.f32.mrf.mxu2  ;;  %v2541_v28 = vpop.f32.mrf.mxu3 }
 0x2e8   : > { %v1088_v13 = vpop.f32.mrf.mxu1 }
 0x2ef   : > { %v1129_v30 = vpop.f32.mrf.mxu2  ;;  %v2543_v31 = vpop.f32.mrf.mxu3 }
 0x2f0   : > { %v1091_v0 = vpop.f32.mrf.mxu1  ;;  %v1318_v40 = vmul.f32 %v1129_v30, %v2392_v55  ;;  %v1246_v55 = vsel %vm777_vm3, %v2516_v24, %v2518_v43  ;;  %v1303_v24 = vsel %vm778_vm2, %v2522_v15, %v2508_v9  ;;  %v1274_v43 = vpop.permute.xlu1 %1273  ;;  %v1354_v15 = vld [vmem:[%s2683_s5 + $0x10] sm:$0xff] }
 0x2f1   : > { %v1301_v9 = vsel %vm778_vm2, %v1274_v43, %v2530_v17  ;;  %1368 = vperm.xlu1 %1726, %v1354_v15   ;;  %v1350_v17 = vld [vmem:[%s2682_s4 + $0x10] sm:$0xff] }
 0x2f7   : > { %v1132_v33 = vpop.f32.mrf.mxu2  ;;  %v1173_v34 = vpop.f32.mrf.mxu3 }
 0x2f8   : > { %v1094_v35 = vpop.f32.mrf.mxu1 }
 0x2ff   : > { %v1135_v37 = vpop.f32.mrf.mxu2  ;;  %v1176_v41 = vpop.f32.mrf.mxu3 }
 0x300   : > { %v1097_v50 = vpop.f32.mrf.mxu1  ;;  %v1320_v36 = vmul.f32 %v1135_v37, %v2367_v44  ;;  %v1306_v44 = vsel %vm778_vm2, %v1294_v14, %v2480_v48  ;;  %v1317_v14 = vmul.f32 %v1126_v27, %v2411_v11  ;;  %v1245_v11 = vsel %vm777_vm3, %v2514_v12, %v2520_v57 }
 0x301   : > { %v1313_v47 = vmul.f32 %v1249_v16, %v1097_v50  ;;  %v1309_v27 = vmul.f32 %v1245_v11, %v2535_v26  ;;  %v1333_v26 = vmul.f32 %v1301_v9, %v2541_v28  ;;  %v1364_v50 = vpop.permute.xlu2 %1363 }
 0x307   : > { %v1138_v54 = vpop.f32.mrf.mxu2  ;;  %v1179_v4 = vpop.f32.mrf.mxu3 }
 0x308   : > { %v1100_v19 = vpop.f32.mrf.mxu1  ;;  %v1321_v3 = vmul.f32 %v1138_v54, %v2370_v46 }
 0x309   : > { %v1314_v62 = vmul.f32 %v1250_v7, %v1100_v19  ;;  %v1319_v19 = vmul.f32 %v1132_v33, %v2378_v45  ;;  %v1247_v45 = vsel %vm777_vm3, %v2512_v56, %v2499_v63  ;;  %v1337_v33 = vmul.f32 %v1305_v42, %v1179_v4 }
 0x30a   : > { %v1329_v52 = vadd.f32 %v1321_v3, %v1313_v47  ;;  %v1304_v63 = vsel %vm778_vm2, %v2524_v61, %v2510_v21  ;;  %v1310_v56 = vmul.f32 %v1246_v55, %v1088_v13  ;;  %v1335_v21 = vmul.f32 %v1303_v24, %v1173_v34 }
 0x30b   : > { %v1336_v6 = vmul.f32 %v1304_v63, %v1176_v41  ;;  %v1302_v13 = vsel %vm778_vm2, %v2526_v60, %v2528_v2  ;;  %v1348_v2 = vld [vmem:[%s2682_s4] sm:$0xff] }
 0x30c   : > { %v1345_v8 = vadd.f32 %v1337_v33, %v1329_v52  ;;  %v1334_v12 = vmul.f32 %v1302_v13, %v2543_v31 }
 0x30f   : > { %v1141_v58 = vpop.f32.mrf.mxu2  ;;  %v1182_v5 = vpop.f32.mrf.mxu3 }
 0x310   : > { %v1103_v20 = vpop.f32.mrf.mxu1  ;;  %v1322_v51 = vmul.f32 %v1141_v58, %v2358_v38  ;;  %v1338_v37 = vmul.f32 %v1306_v44, %v1182_v5 }
 0x311   : > { %v1315_v38 = vmul.f32 %v1251_v22, %v1103_v20 }
 0x312   : > { %v1330_v58 = vadd.f32 %v1322_v51, %v1314_v62 }
 0x314   : > { %v1346_v48 = vadd.f32 %v1338_v37, %v1330_v58 }
 0x317   : > { %v1144_v1 = vpop.f32.mrf.mxu2  ;;  %v1185_v23 = vpop.f32.mrf.mxu3 }
 0x318   : > { %v1323_v10 = vmul.f32 %v1144_v1, %v2349_v32  ;;  %v1339_v54 = vmul.f32 %v1307_v39, %v1185_v23  ;;  %v1248_v32 = vsel %vm777_vm3, %v2492_v53, %v2497_v59  ;;  %v1311_v53 = vmul.f32 %v1247_v45, %v1091_v0  ;;  %v1374_v1 = vpop.permute.xlu2 %1373 }
 0x319   : > { %v1312_v29 = vmul.f32 %v1248_v32, %v1094_v35  ;;  %v1326_v0 = vadd.f32 %v1318_v40, %v1310_v56  ;;  %v1325_v35 = vadd.f32 %v1317_v14, %v1309_v27 }
 0x31a   : > { %v1331_v46 = vadd.f32 %v1323_v10, %v1315_v38  ;;  %v1327_v30 = vadd.f32 %v1319_v19, %v1311_v53 }
 0x31b   : > { %v1328_v59 = vadd.f32 %v1320_v36, %v1312_v29  ;;  %v1342_v34 = vadd.f32 %v1334_v12, %v1326_v0  ;;  %v1341_v60 = vadd.f32 %v1333_v26, %v1325_v35 }
 0x31c   : > { %v1347_v20 = vadd.f32 %v1339_v54, %v1331_v46  ;;  %v1343_v57 = vadd.f32 %v1335_v21, %v1327_v30 }
 0x31d   : > { %v1344_v61 = vadd.f32 %v1336_v6, %v1328_v59 }
 0x31e   : > { %1396 = vmatpush.msra.mxu1 %v1347_v20 }
 0x320   : > { %1397 = vmatpush.msra.mxu1 %v1346_v48 }
 0x322   : > { %1398 = vmatpush.msra.mxu1 %v1345_v8 }
 0x324   : > { %1399 = vmatpush.msra.mxu1 %v1344_v61 }
 0x326   : > { %1400 = vmatpush.msra.mxu1 %v1343_v57 }
 0x328   : > { %1401 = vmatpush.msra.mxu1 %v1342_v34 }
 0x32a   : > { %1402 = vmatpush.msra.mxu1 %v1341_v60 }
 0x32c   : > { %1403 = vmatpush.msra.mxu1 %v2539_v18  ;;  %v1351_v18 = vld [vmem:[%s2682_s4 + $0x18] sm:$0xff] }
 0x32d   : > { %1611 = vmatmul.msk.f32.vlgmr.msra.gmra.mxu1 %vm928_vm4, %v1348_v2 }
 0x335   : > { %1612 = vmatmul.msk.f32.gmra.mxu1 %vm928_vm4, %v1349_v49 }
 0x33d   : > { %1613 = vmatmul.msk.f32.gmra.mxu1 %vm928_vm4, %v1350_v17 }
 0x345   : > { %1614 = vmatmul.msk.f32.gmra.mxu1 %vm928_vm4, %v1351_v18 }
 0x355   : > { %v1359_v28 = vpop.permute.xlu1 %1358 }
 0x363   : > { %v1369_v51 = vpop.permute.xlu1 %1368 }
 0x3aa   : > { %v1405_v31 = vpop.f32.mrf.mxu1 }
 0x3ab   : > { %v1406_v41 = vadd.f32 %v1405_v31, %v1359_v28 }
 0x3ad   : > { %1417 = vst [vmem:[%s393_s15] sm:$0xff] %v1406_v41 }
 0x3b2   : > { %v1408_v4 = vpop.f32.mrf.mxu1 }
 0x3b3   : > { %v1409_v5 = vadd.f32 %v1408_v4, %v1364_v50 }
 0x3b5   : > { %1418 = vst [vmem:[%s393_s15 + $0x8] sm:$0xff] %v1409_v5 }
 0x3ba   : > { %v1411_v7 = vpop.f32.mrf.mxu1 }
 0x3bb   : > { %v1412_v22 = vadd.f32 %v1411_v7, %v1369_v51 }
 0x3bd   : > { %1419 = vst [vmem:[%s393_s15 + $0x10] sm:$0xff] %v1412_v22 }
 0x3c2   : > { %v1414_v23 = vpop.f32.mrf.mxu1 }
 0x3c3   : > { %v1415_v25 = vadd.f32 %v1414_v23, %v1374_v1 }
 0x3c5   : > { %1420 = vst [vmem:[%s393_s15 + $0x18] sm:$0xff] %v1415_v25 }
 0x3c6   : > { %1763 = shalt.err (!%p1760_p11)
}
 0x3c7   : > { %s1837_s15 = smov 128   ;;  %s1838_s17 = smov 256  }
 0x3c8   : > { %s1839_s21 = smov 8  }
 0x3c9   : > { %1628 = dma.vmem_to_hbm [thread:$0]  (%p1945_p8), %s1436_s22, 512, %s1438_s23, %s1422_s30, %s1837_s15, %s1838_s17, %s1839_s21  }
 0x3ca PF: > { %p1634_p12 = scmp.ge.s32.totalorder %s1830_s12, 2  ;;  %s1452_s26 = sand.u32 1, %s1802_s27  }
 0x3cb   : > { %s1453_s18 = scalar_lea.sflag [#allocation4], %s1452_s26 }
 0x3cc   : > { %p1631_p13 = pnand %p1634_p12, %p1949_p9 }
 0x3ce   : > { %p1632_p0 = pneg %p1631_p13 }
 0x3d0   : > { %1797 = dma.done.wait (%p1632_p0), %s1453_s18, 512  }
 0x3d1   : > { %1799 = vsyncadd (%p1632_p0), %s1453_s18, 4294966784  ;;  %s21_s12 = sadd.s32 1, %s1830_s12   ;;  %s2702_s30 = sld [smem:[#allocation6_spill]] }
 0x3d2   : > { %p18_p1 = scmp.ge.s32.totalorder %s21_s12, 6   ;;  %s2703_s9 = sld [smem:[#allocation7_spill]] }
 0x3d3   : > { %s2704_s10 = sld [smem:[#allocation8_spill]]  ;;  %s2706_s27 = smov %s1806_s28 }
 0x3d4   : > { %s2705_s11 = sld [smem:[#allocation9_spill]]  ;;  %s2707_s28 = smov %s1810_s29 }
 0x3d5   : > { %s2708_s29 = smov %s1957_s24  ;;  %20 = sbr.rel (!%p18_p1) target bundleno = 7 (0x7), region = 133 }
 0x3da   :  { %1459 = vsyncpa [#allocation4], 1 }
 0x3db   :  { %1461 = vsyncpa [#allocation4 + $0x1], 1 }

</bundles_post_ra>
